<compile_context>
chip_gen: v7x
topology: tpu7x:2x2x1
jax: 0.10.0
libtpu: 0.0.40
codegen_flags: <defaults>
</compile_context>

<pallas_src>
import functools
import math

import jax
import jax.numpy as jnp
import numpy as np
from jax.experimental import pallas as pl
from jax.experimental.pallas import tpu as pltpu


# ---------------------------------------------------------------------------
# Config (small, consistent with the module's forward)
# ---------------------------------------------------------------------------
N_EMBD = 32          # C
N_HEAD = 4
HEAD_DIM = N_EMBD // N_HEAD
BLOCK_SIZE = 16      # T (sequence length == block_size for this demo)
VTOKEN_SIZE = 4
BATCH = 2
LORA_R = 56
LORA_ALPHA = 1.0


# ---------------------------------------------------------------------------
# Pallas kernel (shape-generic: used both grid-less and with a per-batch grid)
# ---------------------------------------------------------------------------
def attention_kernel(x_ref, wqkv_ref, bqkv_ref, wproj_ref, bproj_ref, bias_ref,
                     y_ref, att_ref, *, n_head):
    B, T, C = x_ref.shape
    H = n_head
    D = C // H

    # ---- fused QKV projection over the flattened batch: (B*T, C) @ (C, 3C) ----
    # bf16 MXU operands, f32 accumulation; bias add in f32.
    x = x_ref[...].reshape(B * T, C).astype(jnp.bfloat16)
    qkv = jnp.dot(x, wqkv_ref[...], preferred_element_type=jnp.float32)
    qkv = qkv + bqkv_ref[...]

    def to_heads(m):                      # (B*T, C) -> (B*H, T, D), bf16 for MXU
        m = m.astype(jnp.bfloat16)
        return jnp.transpose(m.reshape(B, T, H, D), (0, 2, 1, 3)).reshape(B * H, T, D)

    # 1/sqrt(D) is pre-folded into the Q columns of Wqkv (and the Q bias slice).
    q = to_heads(qkv[:, 0 * C:1 * C])
    k = to_heads(qkv[:, 1 * C:2 * C])
    v = to_heads(qkv[:, 2 * C:3 * C])

    # ---- one batched score contraction for all (batch, head) pairs ----------
    # bf16 operands, f32 accumulation; no per-head mask compare/select.
    s = jnp.einsum('ntd,nsd->nts', q, k, preferred_element_type=jnp.float32)
    s = s + bias_ref[...]                 # additive mask bias (0 / -1e30)

    # ---- softmax: f32 elementwise (v5e-safe), exp + EUP approximate recip ----
    m = jnp.max(s, axis=-1, keepdims=True)
    e = jnp.exp(s - m)
    denom = jnp.sum(e, axis=-1, keepdims=True)
    p = e * pl.reciprocal(denom, approx=True)

    # ---- lane-dense, bf16 attention-probability store (last dim T*T = 256) ---
    att_ref[...] = p.reshape(B, H, T * T).astype(att_ref.dtype)

    # ---- attention-weighted values + output projection -----------------------
    o = jnp.einsum('nts,nsd->ntd', p.astype(jnp.bfloat16), v,
                   preferred_element_type=jnp.float32)
    # Output-side head merge kept as an explicit transpose (see header note).
    o = jnp.transpose(o.reshape(B, H, T, D), (0, 2, 1, 3)).reshape(B * T, C)
    y = jnp.dot(o.astype(jnp.bfloat16), wproj_ref[...],
                preferred_element_type=jnp.float32) + bproj_ref[...]
    y_ref[...] = y.reshape(B, T, C).astype(y_ref.dtype)


# ---------------------------------------------------------------------------
# Wrapper
# ---------------------------------------------------------------------------
def _two_tensorcores():
    """True on dual-TensorCore chips (v7x); False (collapsed path) otherwise."""
    try:
        kind = jax.devices()[0].device_kind.lower()
    except Exception:
        return False
    return ("v7" in kind) or ("tpu7" in kind.replace(" ", ""))


def attention_forward(x, wqkv_scaled, bqkv_scaled, wproj_eff, bproj, mask,
                      *, n_head=N_HEAD):
    """x: (B, T, C); wqkv_scaled: (C, 3C) with 1/sqrt(head_dim) pre-folded into
    the Q output columns (see fold_softmax_scale); wproj_eff: (C, C);
    mask: (T, T) of 0/1."""
    B, T, C = x.shape
    H = n_head

    # Hoisted mask handling: additive bias, 0 where attend, -1e30 where masked.
    bias = ((mask - 1.0) * 1e30).astype(jnp.float32)
    # bf16 weights for the MXU (halves HBM->VMEM weight bytes); f32 biases.
    wqkv_bf = wqkv_scaled.astype(jnp.bfloat16)
    wproj_bf = wproj_eff.astype(jnp.bfloat16)
    bqkv2 = bqkv_scaled.reshape(1, 3 * C).astype(jnp.float32)
    bproj2 = bproj.reshape(1, C).astype(jnp.float32)

    kernel = functools.partial(attention_kernel, n_head=H)
    out_shape = (
        jax.ShapeDtypeStruct((B, T, C), x.dtype),
        jax.ShapeDtypeStruct((B, H, T * T), jnp.bfloat16),   # lane-dense att
    )

    if _two_tensorcores():
        # v7x: 2 TensorCores per chip -> one batch element per core via a
        # size-B "parallel" grid axis.  Weights are re-fetched per step but are
        # only a few KiB; total VMEM footprint is << 64 MiB, so no
        # vmem_limit_bytes / block shrinking is needed.
        y, att2 = pl.pallas_call(
            kernel,
            out_shape=out_shape,
            grid_spec=pltpu.PrefetchScalarGridSpec(
                num_scalar_prefetch=0,
                grid=(B,),
                in_specs=[
                    pl.BlockSpec((1, T, C), lambda b: (b, 0, 0)),      # x
                    pl.BlockSpec((C, 3 * C), lambda b: (0, 0)),        # Wqkv (in,out)
                    pl.BlockSpec((1, 3 * C), lambda b: (0, 0)),        # bqkv
                    pl.BlockSpec((C, C), lambda b: (0, 0)),            # Wproj (in,out)
                    pl.BlockSpec((1, C), lambda b: (0, 0)),            # bproj
                    pl.BlockSpec((T, T), lambda b: (0, 0)),            # mask bias
                ],
                out_specs=(
                    pl.BlockSpec((1, T, C), lambda b: (b, 0, 0)),      # y
                    pl.BlockSpec((1, H, T * T), lambda b: (b, 0, 0)),  # att (lane-dense)
                ),
            ),
            compiler_params=pltpu.CompilerParams(
                dimension_semantics=("parallel",)),
        )(x, wqkv_bf, bqkv2, wproj_bf, bproj2, bias)
    else:
        # v5e / v6e (single TensorCore): grid-less single invocation with whole
        # arrays resident in VMEM -> no double-buffering / pipeline machinery
        # for a kernel whose total footprint is only a few tens of KiB.
        vmem = pl.BlockSpec(memory_space=pltpu.MemorySpace.VMEM)
        y, att2 = pl.pallas_call(
            kernel,
            out_shape=out_shape,
            in_specs=[vmem] * 6,
            out_specs=(vmem, vmem),
        )(x, wqkv_bf, bqkv2, wproj_bf, bproj2, bias)

    # Restore the module's (B, H, T, T) float32 attention output.  (Downstream
    # consumers that tolerate bf16 probabilities can drop the astype.)
    att = att2.reshape(B, H, T, T).astype(jnp.float32)
    return y, att


# ---------------------------------------------------------------------------
# Parameter setup (deterministic, synthetic) + pure-JAX reference
# ---------------------------------------------------------------------------
def make_params(key):
    ks = jax.random.split(key, 8)
    C = N_EMBD
    # c_attn LoRA linear: W0 (3C, C), bias (3C,), A (r, C), B (3C, r)
    w0_attn = jax.random.normal(ks[0], (3 * C, C), jnp.float32) * 0.02
    b_attn = jax.random.normal(ks[1], (3 * C,), jnp.float32) * 0.02
    a_attn = jax.random.normal(ks[2], (LORA_R, C), jnp.float32) * 0.02
    bl_attn = jax.random.normal(ks[3], (3 * C, LORA_R), jnp.float32) * 0.02
    # c_proj LoRA linear: W0 (C, C), bias (C,), A (r, C), B (C, r)
    w0_proj = jax.random.normal(ks[4], (C, C), jnp.float32) * 0.02
    b_proj = jax.random.normal(ks[5], (C,), jnp.float32) * 0.02
    a_proj = jax.random.normal(ks[6], (LORA_R, C), jnp.float32) * 0.02
    bl_proj = jax.random.normal(ks[7], (C, LORA_R), jnp.float32) * 0.02

    scaling = LORA_ALPHA / LORA_R
    # fold LoRA:   W_eff = W0 + scaling * B @ A      (shape (out, in))
    w_attn_eff = w0_attn + scaling * bl_attn @ a_attn
    w_proj_eff = w0_proj + scaling * bl_proj @ a_proj
    # kernel / reference consume (in, out)
    return (w_attn_eff.T, b_attn, w_proj_eff.T, b_proj)


def fold_softmax_scale(wqkv_eff, bqkv, *, n_embd=N_EMBD, head_dim=HEAD_DIM):
    """Fold 1/sqrt(head_dim) into the Q slice of the fused QKV weight and bias.

    Done once at parameter-prep time (next to the LoRA fold), so the kernel's
    score contraction needs no per-call scale multiply and no per-call wrapper
    op is added."""
    s = 1.0 / math.sqrt(head_dim)
    wqkv_scaled = wqkv_eff.at[:, :n_embd].multiply(s)   # (in, out): Q output cols
    bqkv_scaled = bqkv.at[:n_embd].multiply(s)
    return wqkv_scaled, bqkv_scaled


def make_mask():
    m = np.tril(np.ones((BLOCK_SIZE, BLOCK_SIZE), dtype=np.float32))
    m[:VTOKEN_SIZE, :VTOKEN_SIZE] = 1.0
    return jnp.asarray(m)


def reference_forward(x, wqkv_eff, bqkv, wproj_eff, bproj, mask):
    B, T, C = x.shape
    qkv = x @ wqkv_eff + bqkv
    q, k, v = jnp.split(qkv, 3, axis=2)

    def to_heads(t):
        return t.reshape(B, T, N_HEAD, HEAD_DIM).transpose(0, 2, 1, 3)

    q, k, v = to_heads(q), to_heads(k), to_heads(v)
    att = (q @ k.transpose(0, 1, 3, 2)) * (1.0 / math.sqrt(HEAD_DIM))
    att = jnp.where(mask[None, None] == 0.0, -jnp.inf, att)
    att = jax.nn.softmax(att, axis=-1)
    out = (att @ v).transpose(0, 2, 1, 3).reshape(B, T, C)
    y = out @ wproj_eff + bproj
    return y, att


if __name__ == "__main__":
    key = jax.random.PRNGKey(0)
    k_x, k_p = jax.random.split(key)
    x = jax.random.normal(k_x, (BATCH, BLOCK_SIZE, N_EMBD), jnp.float32)
    wqkv_eff, bqkv, wproj_eff, bproj = make_params(k_p)
    mask = make_mask()

    # Parameter-prep: fold the softmax scale into the Q slice (kernel-side params).
    wqkv_scaled, bqkv_scaled = fold_softmax_scale(wqkv_eff, bqkv)

    y, att = attention_forward(x, wqkv_scaled, bqkv_scaled, wproj_eff, bproj, mask)
    jax.block_until_ready((y, att))

    # Reference uses the unscaled, module-equivalent parameters.
    y_ref, att_ref = reference_forward(x, wqkv_eff, bqkv, wproj_eff, bproj, mask)
    # Tolerances account for bf16 MXU operands (f32 accumulation), the bf16
    # attention writeback, and the approximate reciprocal in the softmax.
    np.testing.assert_allclose(np.asarray(att), np.asarray(att_ref), rtol=2e-2, atol=3e-3)
    np.testing.assert_allclose(np.asarray(y), np.asarray(y_ref), rtol=2e-2, atol=3e-3)

    print("KERNEL_OK")
</pallas_src>

<mosaic_0001>
module attributes {stable_mosaic.version = 11 : i64} {
  func.func @attention_kernel(%arg0: memref<2x16x32xf32, #tpu.memory_space<vmem>>, %arg1: memref<32x96xbf16, #tpu.memory_space<vmem>>, %arg2: memref<1x96xf32, #tpu.memory_space<vmem>>, %arg3: memref<32x32xbf16, #tpu.memory_space<vmem>>, %arg4: memref<1x32xf32, #tpu.memory_space<vmem>>, %arg5: memref<16x16xf32, #tpu.memory_space<vmem>>, %arg6: memref<2x16x32xf32, #tpu.memory_space<vmem>>, %arg7: memref<2x4x256xbf16, #tpu.memory_space<vmem>>) attributes {dimension_semantics = [], scalar_prefetch = 0 : i64, scratch_operands = 0 : i64, tpu.core_type = #tpu.core_type<tc>} {
    %c0 = arith.constant 0 : index
    %c0_0 = arith.constant 0 : index
    %c0_1 = arith.constant 0 : index
    %0 = vector.load %arg0[%c0, %c0_0, %c0_1] : memref<2x16x32xf32, #tpu.memory_space<vmem>>, vector<2x16x32xf32>
    %1 = vector.shape_cast %0 : vector<2x16x32xf32> to vector<32x32xf32>
    %2 = arith.truncf %1 : vector<32x32xf32> to vector<32x32xbf16>
    %c0_2 = arith.constant 0 : index
    %c0_3 = arith.constant 0 : index
    %3 = vector.load %arg1[%c0_2, %c0_3] : memref<32x96xbf16, #tpu.memory_space<vmem>>, vector<32x96xbf16>
    %cst = arith.constant dense<0.000000e+00> : vector<32x96xf32>
    %4 = tpu.matmul %2, %3, %cst {dimension_numbers = #tpu.dot_dimension_numbers<[1], [0], [0], [1], [0, 0, 1, 1], [], []>} : vector<32x32xbf16>, vector<32x96xbf16>, vector<32x96xf32> -> vector<32x96xf32>
    %c0_4 = arith.constant 0 : index
    %c0_5 = arith.constant 0 : index
    %5 = vector.load %arg2[%c0_4, %c0_5] : memref<1x96xf32, #tpu.memory_space<vmem>>, vector<1x96xf32>
    %6 = vector.broadcast %5 : vector<1x96xf32> to vector<32x96xf32>
    %7 = arith.addf %4, %6 : vector<32x96xf32>
    %8 = vector.extract_strided_slice %7 {offsets = [0, 0], sizes = [32, 32], strides = [1, 1]} : vector<32x96xf32> to vector<32x32xf32>
    %9 = arith.truncf %8 : vector<32x32xf32> to vector<32x32xbf16>
    %10 = vector.shape_cast %9 : vector<32x32xbf16> to vector<2x16x4x8xbf16>
    %11 = tpu.transpose %10, [0, 2, 1, 3] : vector<2x16x4x8xbf16> -> vector<2x4x16x8xbf16>
    %12 = vector.shape_cast %11 : vector<2x4x16x8xbf16> to vector<8x16x8xbf16>
    %13 = vector.extract_strided_slice %7 {offsets = [0, 32], sizes = [32, 32], strides = [1, 1]} : vector<32x96xf32> to vector<32x32xf32>
    %14 = arith.truncf %13 : vector<32x32xf32> to vector<32x32xbf16>
    %15 = vector.shape_cast %14 : vector<32x32xbf16> to vector<2x16x4x8xbf16>
    %16 = tpu.transpose %15, [0, 2, 1, 3] : vector<2x16x4x8xbf16> -> vector<2x4x16x8xbf16>
    %17 = vector.shape_cast %16 : vector<2x4x16x8xbf16> to vector<8x16x8xbf16>
    %18 = vector.extract_strided_slice %7 {offsets = [0, 64], sizes = [32, 32], strides = [1, 1]} : vector<32x96xf32> to vector<32x32xf32>
    %19 = arith.truncf %18 : vector<32x32xf32> to vector<32x32xbf16>
    %20 = vector.shape_cast %19 : vector<32x32xbf16> to vector<2x16x4x8xbf16>
    %21 = tpu.transpose %20, [0, 2, 1, 3] : vector<2x16x4x8xbf16> -> vector<2x4x16x8xbf16>
    %22 = vector.shape_cast %21 : vector<2x4x16x8xbf16> to vector<8x16x8xbf16>
    "tpu.trace_start"() <{level = 10 : i32, message = "ntd,nsd->nts"}> : () -> ()
    %cst_6 = arith.constant dense<0.000000e+00> : vector<8x16x16xf32>
    %23 = tpu.matmul %12, %17, %cst_6 {dimension_numbers = #tpu.dot_dimension_numbers<[2], [2], [1], [1], [0, 0, 0, 1, 1, 1], [0], [0]>} : vector<8x16x8xbf16>, vector<8x16x8xbf16>, vector<8x16x16xf32> -> vector<8x16x16xf32>
    "tpu.trace_stop"() : () -> ()
    %c0_7 = arith.constant 0 : index
    %c0_8 = arith.constant 0 : index
    %24 = vector.load %arg5[%c0_7, %c0_8] : memref<16x16xf32, #tpu.memory_space<vmem>>, vector<16x16xf32>
    %25 = vector.shape_cast %24 : vector<16x16xf32> to vector<1x16x16xf32>
    %26 = vector.broadcast %25 : vector<1x16x16xf32> to vector<8x16x16xf32>
    %27 = arith.addf %23, %26 : vector<8x16x16xf32>
    %cst_9 = arith.constant dense<0xFF800000> : vector<8x16xf32>
    %28 = vector.multi_reduction <maximumf>, %27, %cst_9 [2] : vector<8x16x16xf32> to vector<8x16xf32>
    %29 = vector.shape_cast %28 : vector<8x16xf32> to vector<8x16x1xf32>
    %30 = vector.broadcast %29 : vector<8x16x1xf32> to vector<8x16x16xf32>
    %31 = arith.subf %27, %30 : vector<8x16x16xf32>
    %32 = math.exp %31 : vector<8x16x16xf32>
    %cst_10 = arith.constant dense<0.000000e+00> : vector<8x16xf32>
    %33 = vector.multi_reduction <add>, %32, %cst_10 [2] : vector<8x16x16xf32> to vector<8x16xf32>
    %34 = vector.shape_cast %33 : vector<8x16xf32> to vector<8x16x1xf32>
    %35 = tpu.reciprocal %34 {approx = true} : vector<8x16x1xf32> -> vector<8x16x1xf32>
    %36 = vector.broadcast %35 : vector<8x16x1xf32> to vector<8x16x16xf32>
    %37 = arith.mulf %32, %36 : vector<8x16x16xf32>
    %38 = vector.shape_cast %37 : vector<8x16x16xf32> to vector<2x4x256xf32>
    %39 = arith.truncf %38 : vector<2x4x256xf32> to vector<2x4x256xbf16>
    %c0_11 = arith.constant 0 : index
    %c0_12 = arith.constant 0 : index
    %c0_13 = arith.constant 0 : index
    %40 = vector.load %arg7[%c0_11, %c0_12, %c0_13] : memref<2x4x256xbf16, #tpu.memory_space<vmem>>, vector<2x4x256xbf16>
    tpu.vector_store %arg7[%c0_11, %c0_12, %c0_13], %39 {strides = array<i32>} : memref<2x4x256xbf16, #tpu.memory_space<vmem>>, vector<2x4x256xbf16>,
    %41 = arith.truncf %37 : vector<8x16x16xf32> to vector<8x16x16xbf16>
    "tpu.trace_start"() <{level = 10 : i32, message = "nts,nsd->ntd"}> : () -> ()
    %cst_14 = arith.constant dense<0.000000e+00> : vector<8x16x8xf32>
    %42 = tpu.matmul %41, %22, %cst_14 {dimension_numbers = #tpu.dot_dimension_numbers<[2], [1], [1], [2], [0, 0, 0, 1, 1, 2], [0], [0]>} : vector<8x16x16xbf16>, vector<8x16x8xbf16>, vector<8x16x8xf32> -> vector<8x16x8xf32>
    "tpu.trace_stop"() : () -> ()
    %43 = vector.shape_cast %42 : vector<8x16x8xf32> to vector<2x4x16x8xf32>
    %44 = tpu.transpose %43, [0, 2, 1, 3] : vector<2x4x16x8xf32> -> vector<2x16x4x8xf32>
    %45 = vector.shape_cast %44 : vector<2x16x4x8xf32> to vector<32x32xf32>
    %46 = arith.truncf %45 : vector<32x32xf32> to vector<32x32xbf16>
    %c0_15 = arith.constant 0 : index
    %c0_16 = arith.constant 0 : index
    %47 = vector.load %arg3[%c0_15, %c0_16] : memref<32x32xbf16, #tpu.memory_space<vmem>>, vector<32x32xbf16>
    %cst_17 = arith.constant dense<0.000000e+00> : vector<32x32xf32>
    %48 = tpu.matmul %46, %47, %cst_17 {dimension_numbers = #tpu.dot_dimension_numbers<[1], [0], [0], [1], [0, 0, 1, 1], [], []>} : vector<32x32xbf16>, vector<32x32xbf16>, vector<32x32xf32> -> vector<32x32xf32>
    %c0_18 = arith.constant 0 : index
    %c0_19 = arith.constant 0 : index
    %49 = vector.load %arg4[%c0_18, %c0_19] : memref<1x32xf32, #tpu.memory_space<vmem>>, vector<1x32xf32>
    %50 = vector.broadcast %49 : vector<1x32xf32> to vector<32x32xf32>
    %51 = arith.addf %48, %50 : vector<32x32xf32>
    %52 = vector.shape_cast %51 : vector<32x32xf32> to vector<2x16x32xf32>
    %c0_20 = arith.constant 0 : index
    %c0_21 = arith.constant 0 : index
    %c0_22 = arith.constant 0 : index
    %53 = vector.load %arg6[%c0_20, %c0_21, %c0_22] : memref<2x16x32xf32, #tpu.memory_space<vmem>>, vector<2x16x32xf32>
    tpu.vector_store %arg6[%c0_20, %c0_21, %c0_22], %52 {strides = array<i32>} : memref<2x16x32xf32, #tpu.memory_space<vmem>>, vector<2x16x32xf32>,
    return
  }
}

</mosaic_0001>

<bundles_post_ra>
// kernel: tpu_custom_call.1
= control target key start
LH: loop header
LB: loop body
LE: loop exit
PB: predicated region body
PF: predicated region fallthrough
CT: control target
= control target key end

     0   :  { %13 = vsyncpa [#allocation3], 0  ;;  %s5678_s0 = inlined_call_operand.hbm [shape: f32[2,16,32], index: 0, kind: input, shape index: {}]   ;;  %s5679_s1 = inlined_call_operand.hbm [shape: bf16[32,96], index: 1, kind: input, shape index: {}]   ;;  %s5680_s2 = inlined_call_operand.vmem [shape: f32[1,96], index: 2, kind: input, shape index: {}]   ;;  %s5681_s3 = inlined_call_operand.hbm [shape: bf16[32,32], index: 3, kind: input, shape index: {}]   ;;  %s5682_s4 = inlined_call_operand.vmem [shape: f32[1,32], index: 4, kind: input, shape index: {}]   ;;  %s5683_s5 = inlined_call_operand.vmem [shape: f32[16,16], index: 5, kind: input, shape index: {}]   ;;  %s5684_s6 = inlined_call_operand.hbm [shape: f32[2,16,32], index: 6, kind: output, shape index: {0}]   ;;  %s5685_s7 = inlined_call_operand.hbm [shape: bf16[2,4,256], index: 7, kind: output, shape index: {1}]  }
   0x1   :  { %14 = vsyncpa [#allocation6], 0 }
   0x2   :  { %15 = vsyncpa [#allocation4], 0 }
   0x3   :  { %16 = vsyncpa [#allocation10], 0  ;;  %s4383_s24 = smov [#allocation5]   ;;  %s4265_s28 = scalar_lea.hbm %s5679_s1, 256 }
   0x4   :  { %s34_s25 = sshll.u32 %s4383_s24, 4  ;;  %p4266_p0 = scmp.ne.s32.totalorder %s5679_s1, %s4265_s28  ;;  %s35_s25 = int_to_ptr.vmem [resolvable:$true] %s34_s25 }
   0x5   :  { %p4269_p1 = scmp.lt.u32.totalorder %s4265_s28, %s5679_s1 }
   0x7   :  { %p4271_p2 = pnand %p4269_p1, %p4266_p0 }
   0x9   :  { %4274 = shalt.err (!%p4271_p2)
}
   0xa   :  { %s4275_s10 = scalar_lea.vmem %s35_s25, 256  ;;  %p4280_p4 = scmp.lt.s32.totalorder %s35_s25, %s35_s25 }
   0xb   :  { %p4276_p3 = scmp.ne.s32.totalorder %s35_s25, %s4275_s10  ;;  %p4281_p5 = scmp.lt.s32.totalorder %s4275_s10, %s4275_s10 }
   0xd   :  { %p4282_p6 = por %p4281_p5, %p4280_p4 }
   0xf   :  { %p4283_p7 = pnand %p4282_p6, %p4276_p3 }
  0x11   :  { %4286 = shalt.err (!%p4283_p7)
}
  0x12   :  { %s4384_s11 = smov 64   ;;  %s4385_s12 = smov 4  }
  0x13   :  { %40 = dma.hbm_to_vmem [thread:$0]  %s5679_s1, 256, %s35_s25, [#allocation6], %s4384_s11, %s4384_s11, %s4385_s12  }
  0x14   :  { %s4386_s15 = smov [#allocation2]   ;;  %s4287_s19 = scalar_lea.hbm %s5678_s0, 512 }
  0x15   :  { %s22_s16 = sshll.u32 %s4386_s15, 4  ;;  %p4288_p8 = scmp.ne.s32.totalorder %s5678_s0, %s4287_s19  ;;  %s23_s16 = int_to_ptr.vmem [resolvable:$true] %s22_s16 }
  0x16   :  { %p4291_p9 = scmp.lt.u32.totalorder %s4287_s19, %s5678_s0 }
  0x18   :  { %p4293_p10 = pnand %p4291_p9, %p4288_p8 }
  0x1a   :  { %4296 = shalt.err (!%p4293_p10)
}
  0x1b   :  { %s4297_s24 = scalar_lea.vmem %s23_s16, 512  ;;  %p4302_p12 = scmp.lt.s32.totalorder %s23_s16, %s23_s16 }
  0x1c   :  { %p4298_p11 = scmp.ne.s32.totalorder %s23_s16, %s4297_s24  ;;  %p4303_p13 = scmp.lt.s32.totalorder %s4297_s24, %s4297_s24 }
  0x1e   :  { %p4304_p0 = por %p4303_p13, %p4302_p12 }
  0x20   :  { %p4305_p1 = pnand %p4304_p0, %p4298_p11 }
  0x22   :  { %4308 = shalt.err (!%p4305_p1)
}
  0x23   :  { %s4387_s1 = smov 128   ;;  %s4388_s25 = smov 8  }
  0x24   :  { %28 = dma.hbm_to_vmem [thread:$0]  %s5678_s0, 512, %s23_s16, [#allocation3], %s4387_s1, %s4387_s1, %s4388_s25  }
  0x25   :  { %s4389_s28 = smov [#allocation7]   ;;  %s4309_s9 = scalar_lea.hbm %s5681_s3, 256 }
  0x26   :  { %s48_s29 = sshll.u32 %s4389_s28, 4  ;;  %p4310_p2 = scmp.ne.s32.totalorder %s5681_s3, %s4309_s9  ;;  %s49_s29 = int_to_ptr.vmem [resolvable:$true] %s48_s29 }
  0x27   :  { %p4313_p3 = scmp.lt.u32.totalorder %s4309_s9, %s5681_s3 }
  0x29   :  { %p4315_p4 = pnand %p4313_p3, %p4310_p2 }
  0x2b   :  { %4318 = shalt.err (!%p4315_p4)
}
  0x2c   :  { %s4319_s17 = scalar_lea.vmem %s49_s29, 256  ;;  %p4324_p6 = scmp.lt.s32.totalorder %s49_s29, %s49_s29 }
  0x2d   :  { %p4320_p5 = scmp.ne.s32.totalorder %s49_s29, %s4319_s17  ;;  %p4325_p7 = scmp.lt.s32.totalorder %s4319_s17, %s4319_s17 }
  0x2f   :  { %p4326_p8 = por %p4325_p7, %p4324_p6 }
  0x31   :  { %p4327_p9 = pnand %p4326_p8, %p4320_p5 }
  0x33   :  { %4330 = shalt.err (!%p4327_p9)
}
  0x34   :  { %54 = dma.hbm_to_vmem [thread:$0]  %s5681_s3, 256, %s49_s29, [#allocation6], %s4384_s11, %s4384_s11, %s4385_s12  }
  0x35   :  { %4375 = dma.done.wait [#allocation3], 512  }
  0x36   :  { %4376 = vsyncadd [#allocation3], 4294966784 }
  0x37   :  { %4377 = dma.done.wait [#allocation6], 512  }
  0x38   :  { %4378 = vsyncadd [#allocation6], 4294966784  ;;  %v4197_v0 = vld [vmem:[#allocation5] sm:$0xff]   ;;  %v4198_v1 = vld [vmem:[#allocation5 + $0x8] sm:$0xff]   ;;  %vm98_vm0 = vcmask 261120   ;;  %s4390_s19 = smov 104   ;;  %v212_v21 = vlaneseq }
  0x39   :  { %3962 = vmatprep.subr.bf16.mxu0 %v4197_v0  ;;  %v69_v2 = vld [vmem:[#allocation2] sm:$0xff]  ;;  %v70_v3 = vld [vmem:[#allocation2 + $0x8] sm:$0xff]  ;;  %v71_v4 = vld [vmem:[#allocation2 + $0x10] sm:$0xff]  ;;  %s4391_s20 = smov 120   ;;  %s4393_s21 = smov 96   ;;  %v4396_v29 = vmov 0  }
  0x3a   :  { %3963 = vmatpush3.bf16.msra.mxu0 %v4197_v0  ;;  %v73_v5 = vpack.c.bf16 %v70_v3, %v69_v2  ;;  %v72_v6 = vld [vmem:[#allocation2 + $0x18] sm:$0xff]  ;;  %v3860_v9 = vld [vmem:[%s5680_s2] ss:$0 sm:$0xff]  ;;  %s4392_s2 = smov 112   ;;  %v4394_v19 = vmov 1983009808   ;;  %v4513_v30 = vpack.i.b16 %v4396_v29, %v4396_v29 }
  0x3b   :  { %3964 = vmatprep.subr.bf16.mxu0 %v4198_v1  ;;  %v74_v7 = vpack.c.bf16 %v72_v6, %v71_v4  ;;  %v210_v20 = vunpack.c.l.s4 %v4394_v19  ;;  %v213_v23 = vshrl.u32 %v212_v21, 7  ;;  %v4395_v24 = vmov 1934713408   ;;  %s4400_s27 = smov 24   ;;  %s4401_s28 = smov 32  }
  0x3c   :  { %3966 = vmatprep.mubr.msk.bf16.mxu0 %vm98_vm0, %v73_v5  ;;  %v241_v25 = vunpack.c.l.s4 %v4395_v24  ;;  %vm4398_vm1 = vmmov 0   ;;  %vm1778_vm2 = vcmask 64512   ;;  %vm2155_vm3 = vcmask 130048   ;;  %s4402_s29 = smov 48   ;;  %s4403_s30 = smov 80  }
  0x3d   :  { %v211_v22 = vunpack.c.0.s8 %v210_v20  ;;  %v5686_v20 = vmov 0.0   ;;  %vm3737_vm4 = vcmask 195584   ;;  %vm2720_vm5 = vcmask 392192   ;;  %s4404_s8 = smov [#allocation9]  }
  0x3e   :  { %3965 = vmatpush3.bf16.msra.mxu0 %v4198_v1  ;;  %v242_v34 = vunpack.c.0.s8 %v241_v25  ;;  %3970 = vmatprep.subr.bf16.mxu1 %v5686_v20  ;;  %vm2723_vm6 = vcmask 523264   ;;  %vm2726_vm7 = vcmask 654336   ;;  %vm2729_vm8 = vcmask 785408   ;;  %s3843_s9 = sshll.u32 %s4404_s8, 4  ;;  %s3844_s9 = int_to_ptr.vmem [resolvable:$true] %s3843_s9 }
  0x3f   :  { %v4517_v33 = vsub.s32 %v211_v22, %v213_v23  ;;  %3976 = vmatprep.subr.bf16.mxu0 %v5686_v20  ;;  %3972 = vmatprep.mubr.msk.bf16.mxu1 %vm4398_vm1, %v5686_v20  ;;  %vm2732_vm9 = vcmask 916480   ;;  %s4331_s10 = scalar_lea.vmem %s3844_s9, 128  ;;  %p4336_p11 = scmp.lt.s32.totalorder %s3844_s9, %s3844_s9 }
  0x40   :  { %v4528_v43 = vsub.s32 %v242_v34, %v213_v23  ;;  %p4332_p10 = scmp.ne.s32.totalorder %s3844_s9, %s4331_s10  ;;  %p4337_p12 = scmp.lt.s32.totalorder %s4331_s10, %s4331_s10 }
  0x41   :  { %3967 = vmatmul.mubr.msk.bf16.vlgmr.msra.gmra.mrb[0].mxu0 %vm98_vm0, %v74_v7 }
  0x42   :  { %3978 = vmatprep.mubr.msk.bf16.mxu0 %vm4398_vm1, %v5686_v20  ;;  %p4338_p13 = por %p4337_p12, %p4336_p11 }
  0x44   :  { %p4339_p0 = pnand %p4338_p13, %p4332_p10 }
 0x114   :  { %v3968_v8 = vpop.f32.mrb[0].mxu0 }
 0x115   :  { %v139_v10 = vpop.f32.mrb[1].mxu0  ;;  %v148_v12 = vadd.f32 %v3968_v8, %v3860_v9 }
 0x116   :  { %v3969_v11 = vpop.f32.mrb[2].mxu0  ;;  %v140_v15 = vadd.f32 %v3860_v9, %v139_v10 }
 0x117   :  { %v151_v13 = vadd.f32 %v3969_v11, %v3860_v9  ;;  %v142_v14 = vpop.f32.mrb[3].mxu0 }
 0x118   :  { %v143_v16 = vadd.f32 %v3860_v9, %v142_v14 }
 0x119   :  { %v4496_v17 = vpack.c.bf16 %v151_v13, %v148_v12 }
 0x11a   :  { %v4498_v18 = vpack.c.bf16 %v143_v16, %v140_v15 }
 0x11c   :  { %166 = vrot.lane.b32.xlu1 %v4498_v18, %s4390_s19  ;;  %158 = vrot.lane.b32.xlu0 %v4498_v18, %s4391_s20  ;;  %v174_v32 = vshrl.u32 %v4498_v18, 16 }
 0x120   :  { %160 = vrot.lane.b32.xlu1 %v4496_v17, %s4391_s20  ;;  %162 = vrot.lane.b32.xlu0 %v4498_v18, %s4392_s2 }
 0x124   :  { %168 = vrot.lane.b32.xlu1 %v4496_v17, %s4390_s19  ;;  %164 = vrot.lane.b32.xlu0 %v4496_v17, %s4392_s2 }
 0x128   :  { %696 = vrot.lane.b32.xlu0 %v4498_v18, %s4393_s21 }
 0x18e   :  { %v4510_v26 = vpop.permute.xlu1 %166  ;;  %v159_v27 = vpop.permute.xlu0 %158 }
 0x18f   :  { %v175_v28 = vshrl.u32 %v159_v27, 16  ;;  %700 = vrot.lane.b32.xlu1 %v159_v27, %s4393_s21  ;;  %v172_v31 = vpack.i.b16 %v159_v27, %v4498_v18  ;;  %v183_v37 = vshrl.u32 %v4510_v26, 16 }
 0x191   :  { %v176_v35 = vpack.i.b16 %v175_v28, %v174_v32  ;;  %v208_v38 = vcombine.high %v172_v31, %v4513_v30  ;;  %v215_v42 = vrot.slane %v172_v31, %v4517_v33 }
 0x192   :  { %v163_v36 = vpop.permute.xlu0 %162  ;;  %v4523_v39 = vpop.permute.xlu1 %160 }
 0x193   :  { %708 = vrot.lane.b32.xlu1 %v4510_v26, %s4393_s21  ;;  %v180_v40 = vpack.i.b16 %v4510_v26, %v163_v36  ;;  %v182_v41 = vshrl.u32 %v163_v36, 16  ;;  %704 = vrot.lane.b32.xlu0 %v163_v36, %s4393_s21  ;;  %v274_v44 = vcombine.high %v176_v35, %v4513_v30  ;;  %v222_v48 = vrot.slane %v208_v38, %v4517_v33 }
 0x194   :  { %v281_v51 = vrot.slane %v176_v35, %v4517_v33 }
 0x195   :  { %v184_v45 = vpack.i.b16 %v183_v37, %v182_v41  ;;  %v223_v46 = vcombine.high %v180_v40, %v4513_v30  ;;  %v230_v47 = vrot.slane %v180_v40, %v4517_v33  ;;  %v288_v55 = vrot.slane %v274_v44, %v4517_v33 }
 0x196   :  { %v4544_v59 = vpop.permute.xlu1 %168  ;;  %v4548_v0 = vpop.permute.xlu0 %164 }
 0x197   :  { %702 = vrot.lane.b32.xlu1 %v4523_v39, %s4393_s21  ;;  %v237_v49 = vrot.slane %v223_v46, %v4517_v33  ;;  %v238_v50 = vcombine.low %v215_v42, %v230_v47  ;;  %698 = vrot.lane.b32.xlu0 %v4496_v17, %s4393_s21  ;;  %v239_v52 = vcombine.high %v215_v42, %v230_v47 }
 0x198   :  { %v289_v53 = vcombine.high %v184_v45, %v4513_v30  ;;  %v296_v54 = vrot.slane %v184_v45, %v4517_v33 }
 0x199   :  { %v246_v56 = vrot.slane %v238_v50, %v4528_v43  ;;  %v254_v57 = vcombine.low %v222_v48, %v237_v49  ;;  %v255_v58 = vcombine.high %v222_v48, %v237_v49  ;;  %v253_v60 = vrot.slane %v239_v52, %v4528_v43 }
 0x19a   :  { %v303_v61 = vrot.slane %v289_v53, %v4517_v33  ;;  %v304_v62 = vcombine.low %v281_v51, %v296_v54  ;;  %v305_v63 = vcombine.high %v281_v51, %v296_v54  ;;  %v202_v51 = vpack.i.b16 %v4544_v59, %v4548_v0 }
 0x19b   :  { %710 = vrot.lane.b32.xlu1 %v4544_v59, %s4393_s21  ;;  %v262_v1 = vrot.slane %v254_v57, %v4528_v43  ;;  %v269_v2 = vrot.slane %v255_v58, %v4528_v43  ;;  %706 = vrot.lane.b32.xlu0 %v4548_v0, %s4393_s21  ;;  %v472_v7 = vcombine.low %v246_v56, %v253_v60  ;;  %v205_v52 = vshrl.u32 %v4544_v59, 16 }
 0x19c   :  { %v312_v3 = vrot.slane %v304_v62, %v4528_v43  ;;  %v319_v4 = vrot.slane %v305_v63, %v4528_v43  ;;  %v320_v5 = vcombine.low %v288_v55, %v303_v61  ;;  %v321_v6 = vcombine.high %v288_v55, %v303_v61 }
 0x19d   :  { %v3865_v8 = vcombine.high %v246_v56, %v253_v60  ;;  %v488_v9 = vcombine.low %v262_v1, %v269_v2  ;;  %v3866_v10 = vcombine.high %v262_v1, %v269_v2  ;;  %v479_v13 = vrot.slane %v472_v7, %v4517_v33 }
 0x19e   :  { %v522_v11 = vcombine.low %v312_v3, %v319_v4  ;;  %v3867_v12 = vcombine.high %v312_v3, %v319_v4  ;;  %v328_v15 = vrot.slane %v320_v5, %v4528_v43  ;;  %v335_v16 = vrot.slane %v321_v6, %v4528_v43  ;;  %v697_v3 = vpop.permute.xlu0 %696 }
 0x19f   :  { %1232 = vrot.lane.b32.xlu1 %v4498_v18, %s4384_s11  ;;  %1236 = vrot.lane.b32.xlu0 %v159_v27, %s4384_s11  ;;  %v487_v14 = vrot.slane %v3865_v8, %v4517_v33  ;;  %v495_v19 = vrot.slane %v488_v9, %v4517_v33  ;;  %v503_v18 = vrot.slane %v3866_v10, %v4517_v33  ;;  %v204_v53 = vshrl.u32 %v4548_v0, 16 }
 0x1a0   :  { %v529_v22 = vrot.slane %v522_v11, %v4517_v33  ;;  %v537_v23 = vrot.slane %v3867_v12, %v4517_v33  ;;  %v538_v24 = vcombine.low %v328_v15, %v335_v16  ;;  %v3868_v25 = vcombine.high %v328_v15, %v335_v16 }
 0x1a1   :  { %v504_v21 = vcombine.low %v479_v13, %v487_v14  ;;  %v512_v27 = vcombine.low %v495_v19, %v503_v18  ;;  %v194_v54 = vpack.i.b16 %v4523_v39, %v4496_v17  ;;  %v197_v55 = vshrl.u32 %v4523_v39, 16 }
 0x1a2   :  { %v554_v28 = vcombine.low %v529_v22, %v537_v23  ;;  %v545_v29 = vrot.slane %v538_v24, %v4517_v33  ;;  %v553_v31 = vrot.slane %v3868_v25, %v4517_v33  ;;  %v355_v56 = vcombine.high %v202_v51, %v4513_v30 }
 0x1a3   :  { %1234 = vrot.lane.b32.xlu1 %v4496_v17, %s4384_s11  ;;  %v511_v32 = vrot.slane %v504_v21, %v4528_v43  ;;  %v519_v34 = vrot.slane %v512_v27, %v4528_v43  ;;  %v196_v57 = vshrl.u32 %v4496_v17, 16  ;;  %v206_v58 = vpack.i.b16 %v205_v52, %v204_v53 }
 0x1a4   :  { %v562_v35 = vcombine.low %v545_v29, %v553_v31  ;;  %v561_v38 = vrot.slane %v554_v28, %v4528_v43  ;;  %v340_v60 = vcombine.high %v194_v54, %v4513_v30  ;;  %v362_v61 = vrot.slane %v202_v51, %v4517_v33 }
 0x1a5   :  { %v4582_v37 = vcombine.high %v511_v32, %v519_v34  ;;  %v198_v62 = vpack.i.b16 %v197_v55, %v196_v57  ;;  %v347_v63 = vrot.slane %v194_v54, %v4517_v33  ;;  %v369_v1 = vrot.slane %v355_v56, %v4517_v33 }
 0x1a6   :  { %v421_v2 = vcombine.high %v206_v58, %v4513_v30  ;;  %v354_v4 = vrot.slane %v340_v60, %v4517_v33  ;;  %v428_v17 = vrot.slane %v206_v58, %v4517_v33  ;;  %v716_v10 = vshrl.u32 %v697_v3, 16 }
 0x1a7   :  { %1240 = vrot.lane.b32.xlu1 %v163_v36, %s4384_s11  ;;  %v4580_v36 = vcombine.low %v511_v32, %v519_v34  ;;  %v681_v44 = vshrl.u32 %v4582_v37, 16  ;;  %v370_v5 = vcombine.low %v347_v63, %v362_v61  ;;  %v371_v6 = vcombine.high %v347_v63, %v362_v61 }
 0x1a8   :  { %v406_v7 = vcombine.high %v198_v62, %v4513_v30  ;;  %v413_v8 = vrot.slane %v198_v62, %v4517_v33  ;;  %v386_v9 = vcombine.low %v354_v4, %v369_v1  ;;  %v387_v12 = vcombine.high %v354_v4, %v369_v1 }
 0x1a9   :  { %v675_v42 = vshrl.u32 %v4580_v36, 16  ;;  %v435_v13 = vrot.slane %v421_v2, %v4517_v33  ;;  %v4626_v16 = vrot.slane %v370_v5, %v4528_v43  ;;  %v4629_v19 = vrot.slane %v371_v6, %v4528_v43 }
 0x1aa   :  { %v420_v18 = vrot.slane %v406_v7, %v4517_v33  ;;  %v436_v21 = vcombine.low %v413_v8, %v428_v17  ;;  %v4633_v23 = vrot.slane %v386_v9, %v4528_v43  ;;  %v437_v24 = vcombine.high %v413_v8, %v428_v17 }
 0x1ab   :  { %1244 = vrot.lane.b32.xlu1 %v4510_v26, %s4384_s11  ;;  %v569_v26 = vrot.slane %v562_v35, %v4528_v43  ;;  %v4636_v27 = vrot.slane %v387_v12, %v4528_v43 }
 0x1ac   :  { %v452_v28 = vcombine.low %v420_v18, %v435_v13  ;;  %v4651_v55 = vrot.slane %v437_v24, %v4528_v43 }
 0x1ad   :  { %v4586_v40 = vcombine.low %v561_v38, %v569_v26  ;;  %v4588_v41 = vcombine.high %v561_v38, %v569_v26  ;;  %v4642_v26 = vrot.slane %v436_v21, %v4528_v43  ;;  %v588_v57 = vcombine.low %v4633_v23, %v4636_v27 }
 0x1ae   :  { %v4654_v56 = vrot.slane %v452_v28, %v4528_v43 }
 0x1af   :  { %v676_v46 = vshrl.u32 %v4586_v40, 16  ;;  %v682_v48 = vshrl.u32 %v4588_v41, 16  ;;  %v4681_v24 = vrot.slane %v588_v57, %v4517_v33 }
 0x1b1   :  { %v4598_v49 = vpack.i.b16 %v676_v46, %v675_v42  ;;  %v4600_v50 = vpack.i.b16 %v682_v48, %v681_v44  ;;  %v453_v42 = vcombine.high %v420_v18, %v435_v13 }
 0x1b3   :  { %v4662_v2 = vrot.slane %v453_v42, %v4528_v43 }
 0x201   :  { %v701_v11 = vpop.permute.xlu1 %700 }
 0x202   :  { %v714_v14 = vpack.i.b16 %v701_v11, %v697_v3  ;;  %v717_v15 = vshrl.u32 %v701_v11, 16 }
 0x204   :  { %v718_v22 = vpack.i.b16 %v717_v15, %v716_v10  ;;  %v744_v29 = vcombine.high %v714_v14, %v4513_v30  ;;  %v751_v48 = vrot.slane %v714_v14, %v4517_v33 }
 0x205   :  { %v709_v25 = vpop.permute.xlu1 %708  ;;  %v705_v32 = vpop.permute.xlu0 %704 }
 0x206   :  { %v725_v31 = vshrl.u32 %v709_v25, 16  ;;  %v722_v35 = vpack.i.b16 %v709_v25, %v705_v32  ;;  %v724_v38 = vshrl.u32 %v705_v32, 16  ;;  %v810_v46 = vcombine.high %v718_v22, %v4513_v30 }
 0x207   :  { %v758_v58 = vrot.slane %v744_v29, %v4517_v33  ;;  %v817_v3 = vrot.slane %v718_v22, %v4517_v33  ;;  %v3870_v25 = vcombine.high %v4633_v23, %v4636_v27  ;;  %v3872_v32 = vcombine.high %v4654_v56, %v4662_v2 }
 0x208   :  { %v726_v51 = vpack.i.b16 %v725_v31, %v724_v38  ;;  %v759_v52 = vcombine.high %v722_v35, %v4513_v30  ;;  %v766_v53 = vrot.slane %v722_v35, %v4517_v33  ;;  %v824_v4 = vrot.slane %v810_v46, %v4517_v33 }
 0x209   :  { %v703_v54 = vpop.permute.xlu1 %702  ;;  %v699_v60 = vpop.permute.xlu0 %698  ;;  %v638_v31 = vcombine.low %v4654_v56, %v4662_v2  ;;  %v5690_v23 = vcombine.low %v4626_v16, %v4629_v19 }
 0x20a   :  { %v773_v61 = vrot.slane %v759_v52, %v4517_v33  ;;  %v774_v62 = vcombine.low %v751_v48, %v766_v53  ;;  %v775_v63 = vcombine.high %v751_v48, %v766_v53  ;;  %v825_v1 = vcombine.high %v726_v51, %v4513_v30 }
 0x20b   :  { %v832_v5 = vrot.slane %v726_v51, %v4517_v33  ;;  %v733_v17 = vshrl.u32 %v703_v54, 16  ;;  %v732_v8 = vshrl.u32 %v699_v60, 16  ;;  %v730_v22 = vpack.i.b16 %v703_v54, %v699_v60 }
 0x20c   :  { %v790_v6 = vcombine.low %v758_v58, %v773_v61  ;;  %v791_v7 = vcombine.high %v758_v58, %v773_v61  ;;  %v4668_v10 = vrot.slane %v774_v62, %v4528_v43  ;;  %v4671_v11 = vrot.slane %v775_v63, %v4528_v43 }
 0x20d   :  { %v711_v9 = vpop.permute.xlu1 %710  ;;  %v839_v12 = vrot.slane %v825_v1, %v4517_v33  ;;  %v840_v13 = vcombine.low %v817_v3, %v832_v5  ;;  %v707_v14 = vpop.permute.xlu0 %706  ;;  %v841_v21 = vcombine.high %v817_v3, %v832_v5  ;;  %v734_v38 = vpack.i.b16 %v733_v17, %v732_v8 }
 0x20e   :  { %v4675_v15 = vrot.slane %v790_v6, %v4528_v43  ;;  %v4678_v18 = vrot.slane %v791_v7, %v4528_v43  ;;  %v1008_v51 = vcombine.low %v4668_v10, %v4671_v11  ;;  %v3873_v52 = vcombine.high %v4668_v10, %v4671_v11 }
 0x20f   :  { %v856_v35 = vcombine.low %v824_v4, %v839_v12  ;;  %v4694_v46 = vrot.slane %v840_v13, %v4528_v43  ;;  %v857_v48 = vcombine.high %v824_v4, %v839_v12  ;;  %v4701_v54 = vrot.slane %v841_v21, %v4528_v43 }
 0x210   :  { %v1024_v57 = vcombine.low %v4675_v15, %v4678_v18  ;;  %v876_v58 = vcombine.high %v730_v22, %v4513_v30  ;;  %v741_v60 = vshrl.u32 %v711_v9, 16  ;;  %v3874_v61 = vcombine.high %v4675_v15, %v4678_v18 }
 0x211   :  { %v1233_v42 = vpop.permute.xlu1 %1232  ;;  %v1237_v53 = vpop.permute.xlu0 %1236  ;;  %v738_v62 = vpack.i.b16 %v711_v9, %v707_v14  ;;  %v740_v63 = vshrl.u32 %v707_v14, 16  ;;  %v4709_v3 = vrot.slane %v856_v35, %v4528_v43  ;;  %v883_v4 = vrot.slane %v730_v22, %v4517_v33 }
 0x212   :  { %v1252_v1 = vshrl.u32 %v1233_v42, 16  ;;  %v1250_v5 = vpack.i.b16 %v1237_v53, %v1233_v42  ;;  %v1253_v6 = vshrl.u32 %v1237_v53, 16  ;;  %v4715_v17 = vrot.slane %v857_v48, %v4528_v43 }
 0x213   :  { %v742_v8 = vpack.i.b16 %v741_v60, %v740_v63  ;;  %v891_v10 = vcombine.high %v738_v62, %v4513_v30  ;;  %v898_v11 = vrot.slane %v738_v62, %v4517_v33  ;;  %v1058_v9 = vcombine.low %v4694_v46, %v4701_v54 }
 0x214   :  { %v890_v12 = vrot.slane %v876_v58, %v4517_v33  ;;  %v942_v13 = vcombine.high %v734_v38, %v4513_v30  ;;  %v1254_v14 = vpack.i.b16 %v1253_v6, %v1252_v1  ;;  %v3875_v35 = vcombine.high %v4694_v46, %v4701_v54 }
 0x215   :  { %v4712_v7 = vpop.permute.xlu1 %1234  ;;  %v905_v15 = vrot.slane %v891_v10, %v4517_v33  ;;  %v906_v18 = vcombine.low %v883_v4, %v898_v11  ;;  %v907_v21 = vcombine.high %v883_v4, %v898_v11  ;;  %v957_v22 = vcombine.high %v742_v8, %v4513_v30 }
 0x216   :  { %v949_v42 = vrot.slane %v734_v38, %v4517_v33  ;;  %v964_v48 = vrot.slane %v742_v8, %v4517_v33  ;;  %v1280_v53 = vcombine.high %v1250_v5, %v4513_v30  ;;  %v1346_v11 = vcombine.high %v1254_v14, %v4513_v30 }
 0x217   :  { %v914_v58 = vrot.slane %v906_v18, %v4528_v43  ;;  %v921_v62 = vrot.slane %v907_v21, %v4528_v43  ;;  %v922_v63 = vcombine.low %v890_v12, %v905_v15  ;;  %v923_v1 = vcombine.high %v890_v12, %v905_v15 }
 0x218   :  { %v971_v4 = vrot.slane %v957_v22, %v4517_v33  ;;  %v972_v6 = vcombine.low %v949_v42, %v964_v48  ;;  %v973_v10 = vcombine.high %v949_v42, %v964_v48  ;;  %v956_v46 = vrot.slane %v942_v13, %v4517_v33 }
 0x219   :  { %v1241_v60 = vpop.permute.xlu1 %1240  ;;  %v1287_v38 = vrot.slane %v1250_v5, %v4517_v33  ;;  %v4737_v54 = vrot.slane %v1008_v51, %v4517_v33  ;;  %v4740_v8 = vrot.slane %v3873_v52, %v4517_v33  ;;  %v4743_v18 = vrot.slane %v922_v63, %v4528_v43 }
 0x21a   :  { %v4746_v12 = vrot.slane %v923_v1, %v4528_v43  ;;  %v1108_v15 = vcombine.low %v914_v58, %v921_v62  ;;  %v3877_v21 = vcombine.high %v914_v58, %v921_v62  ;;  %v988_v42 = vcombine.low %v956_v46, %v971_v4 }
 0x21b   :  { %v1294_v13 = vrot.slane %v1280_v53, %v4517_v33  ;;  %v1353_v5 = vrot.slane %v1254_v14, %v4517_v33  ;;  %v1031_v51 = vrot.slane %v1024_v57, %v4517_v33  ;;  %v4752_v48 = vrot.slane %v972_v6, %v4528_v43 }
 0x21c   :  { %v4755_v52 = vrot.slane %v973_v10, %v4528_v43  ;;  %v989_v63 = vcombine.high %v956_v46, %v971_v4  ;;  %v1360_v1 = vrot.slane %v1346_v11, %v4517_v33  ;;  %v1260_v47 = vshrl.u32 %v1241_v60, 16 }
 0x21d   :  { %v1245_v22 = vpop.permute.xlu1 %1244  ;;  %v1039_v62 = vrot.slane %v3874_v61, %v4517_v33  ;;  %v4760_v53 = vrot.slane %v1108_v15, %v4517_v33  ;;  %v4763_v14 = vrot.slane %v3877_v21, %v4517_v33  ;;  %v1124_v57 = vcombine.low %v4743_v18, %v4746_v12 }
 0x21e   :  { %v1258_v45 = vpack.i.b16 %v1245_v22, %v1241_v60  ;;  %v1261_v58 = vshrl.u32 %v1245_v22, 16  ;;  %v3878_v6 = vcombine.high %v4743_v18, %v4746_v12  ;;  %v4770_v4 = vrot.slane %v988_v42, %v4528_v43 }
 0x21f   :  { %v1003_v11 = vrot.slane %v989_v63, %v4528_v43  ;;  %v1048_v46 = vcombine.low %v1031_v51, %v1039_v62  ;;  %v1074_v15 = vcombine.low %v4709_v3, %v4715_v17  ;;  %v3876_v21 = vcombine.high %v4709_v3, %v4715_v17 }
 0x220   :  { %v1262_v10 = vpack.i.b16 %v1261_v58, %v1260_v47  ;;  %v1295_v60 = vcombine.high %v1258_v45, %v4513_v30  ;;  %v1302_v61 = vrot.slane %v1258_v45, %v4517_v33  ;;  %v1040_v45 = vcombine.low %v4737_v54, %v4740_v8 }
 0x221   :  { %v1065_v63 = vrot.slane %v1058_v9, %v4517_v33  ;;  %v1073_v51 = vrot.slane %v3875_v35, %v4517_v33  ;;  %v1055_v44 = vrot.slane %v1048_v46, %v4528_v43  ;;  %v1081_v9 = vrot.slane %v1074_v15, %v4517_v33 }
 0x222   :  { %v1309_v22 = vrot.slane %v1295_v60, %v4517_v33  ;;  %v1310_v18 = vcombine.low %v1287_v38, %v1302_v61  ;;  %v1311_v12 = vcombine.high %v1287_v38, %v1302_v61  ;;  %v1361_v42 = vcombine.high %v1262_v10, %v4513_v30 }
 0x223   :  { %v1368_v47 = vrot.slane %v1262_v10, %v4517_v33  ;;  %v1089_v35 = vrot.slane %v3876_v21, %v4517_v33  ;;  %v3879_v46 = vcombine.high %v4752_v48, %v4755_v52  ;;  %v3880_v15 = vcombine.high %v4770_v4, %v1003_v11 }
 0x224   :  { %v1318_v58 = vrot.slane %v1310_v18, %v4528_v43  ;;  %v1325_v62 = vrot.slane %v1311_v12, %v4528_v43  ;;  %v1326_v3 = vcombine.low %v1294_v13, %v1309_v22  ;;  %v1327_v17 = vcombine.high %v1294_v13, %v1309_v22 }
 0x225   :  { %v1375_v60 = vrot.slane %v1361_v42, %v4517_v33  ;;  %v1376_v38 = vcombine.low %v1353_v5, %v1368_v47  ;;  %v1377_v61 = vcombine.high %v1353_v5, %v1368_v47  ;;  %v1158_v5 = vcombine.low %v4752_v48, %v4755_v52 }
 0x226   :  { %v1334_v10 = vrot.slane %v1326_v3, %v4528_v43  ;;  %v1341_v54 = vrot.slane %v1327_v17, %v4528_v43  ;;  %v1544_v12 = vcombine.low %v1318_v58, %v1325_v62  ;;  %v3881_v13 = vcombine.high %v1318_v58, %v1325_v62 }
 0x227   :  { %v1384_v8 = vrot.slane %v1376_v38, %v4528_v43  ;;  %v1391_v18 = vrot.slane %v1377_v61, %v4528_v43  ;;  %v1392_v22 = vcombine.low %v1360_v1, %v1375_v60  ;;  %v1393_v42 = vcombine.high %v1360_v1, %v1375_v60 }
 0x228   :  { %v1174_v47 = vcombine.low %v4770_v4, %v1003_v11  ;;  %v1560_v21 = vcombine.low %v1334_v10, %v1341_v54  ;;  %v1047_v3 = vrot.slane %v1040_v45, %v4528_v43  ;;  %v3882_v17 = vcombine.high %v1334_v10, %v1341_v54 }
 0x229   :  { %v1594_v38 = vcombine.low %v1384_v8, %v1391_v18  ;;  %v1090_v61 = vcombine.low %v1065_v63, %v1073_v51  ;;  %v1098_v58 = vcombine.low %v1081_v9, %v1089_v35  ;;  %v1551_v62 = vrot.slane %v1544_v12, %v4517_v33 }
 0x22a   :  { %v1559_v34 = vrot.slane %v3881_v13, %v4517_v33  ;;  %v3883_v29 = vcombine.high %v1384_v8, %v1391_v18  ;;  %v1056_v28 = vcombine.low %v1047_v3, %v1055_v44  ;;  %v1400_v48 = vrot.slane %v1392_v22, %v4528_v43 }
 0x22b   :  { %v1407_v52 = vrot.slane %v1393_v42, %v4528_v43  ;;  %v1097_v1 = vrot.slane %v1090_v61, %v4528_v43  ;;  %v1105_v4 = vrot.slane %v1098_v58, %v4528_v43  ;;  %v1567_v11 = vrot.slane %v1560_v21, %v4517_v33 }
 0x22c   :  { %v1131_v45 = vrot.slane %v1124_v57, %v4517_v33  ;;  %v1139_v63 = vrot.slane %v3878_v6, %v4517_v33  ;;  %v1165_v51 = vrot.slane %v1158_v5, %v4517_v33  ;;  %v1575_v60 = vrot.slane %v3882_v17, %v4517_v33 }
 0x22d   :  { %v1601_v10 = vrot.slane %v1594_v38, %v4517_v33  ;;  %v1106_v54 = vcombine.low %v1097_v1, %v1105_v4  ;;  %v1173_v9 = vrot.slane %v3879_v46, %v4517_v33  ;;  %v1609_v35 = vrot.slane %v3883_v29, %v4517_v33 }
 0x22e   :  { %v1057_v8 = vcombine.high %v1047_v3, %v1055_v44  ;;  %v1181_v18 = vrot.slane %v1174_v47, %v4517_v33  ;;  %v1189_v12 = vrot.slane %v3880_v15, %v4517_v33  ;;  %v1211_v57 = vshrl.u32 %v1056_v28, 16 }
 0x22f   :  { %v1210_v13 = vpack.i.b16 %v1106_v54, %v1056_v28  ;;  %v1212_v22 = vshrl.u32 %v1106_v54, 16  ;;  %v1107_v6 = vcombine.high %v1097_v1, %v1105_v4  ;;  %v1148_v42 = vcombine.low %v1131_v45, %v1139_v63 }
 0x230   :  { %v1190_v5 = vcombine.low %v1165_v51, %v1173_v9  ;;  %v1198_v21 = vcombine.low %v1181_v18, %v1189_v12  ;;  %v1576_v17 = vcombine.low %v1551_v62, %v1559_v34  ;;  %v1610_v61 = vcombine.low %v1400_v48, %v1407_v52 }
 0x231   :  { %v3884_v38 = vcombine.high %v1400_v48, %v1407_v52  ;;  %v1783_v58 = vsel %vm1778_vm2, %v1210_v13, 0  ;;  %v1213_v46 = vpack.i.b16 %v1212_v22, %v1211_v57  ;;  %v645_v44 = vrot.slane %v638_v31, %v4517_v33 }
 0x232   :  { %v653_v28 = vrot.slane %v3872_v32, %v4517_v33  ;;  %3971 = vmatpush3.bf16.xpose.msra.mxu1 %v1783_v58  ;;  %v1217_v29 = vshrl.u32 %v1057_v8, 16  ;;  %v1140_v34 = vcombine.low %v4760_v53, %v4763_v14  ;;  %v1218_v15 = vshrl.u32 %v1107_v6, 16 }
 0x233   :  { %v1830_v47 = vsel %vm1778_vm2, %v1213_v46, 0  ;;  %3982 = vmatprep.subr.bf16.mxu1 %v5686_v20  ;;  %v1205_v3 = vrot.slane %v1198_v21, %v4528_v43  ;;  %v1584_v62 = vcombine.low %v1567_v11, %v1575_v60  ;;  %v1216_v31 = vpack.i.b16 %v1107_v6, %v1057_v8 }
 0x234   :  { %3977 = vmatpush3.bf16.xpose.msra.mxu0 %v1830_v47  ;;  %v1155_v48 = vrot.slane %v1148_v42, %v4528_v43  ;;  %v1197_v56 = vrot.slane %v1190_v5, %v4528_v43  ;;  %v4836_v2 = vrot.slane %v1576_v17, %v4528_v43  ;;  %v1617_v53 = vrot.slane %v1610_v61, %v4517_v33 }
 0x235   :  { %3988 = vmatprep.subr.bf16.mxu0 %v5686_v20  ;;  %v4840_v32 = vrot.slane %v1584_v62, %v4528_v43  ;;  %v1625_v14 = vrot.slane %v3884_v38, %v4517_v33  ;;  %v1626_v52 = vcombine.low %v1601_v10, %v1609_v35  ;;  %v603_v1 = vrot.slane %v3870_v25, %v4517_v33 }
 0x236   :  { %v5688_v4 = vcombine.low %v4642_v26, %v4651_v55  ;;  %v5689_v45 = vcombine.high %v4642_v26, %v4651_v55  ;;  %v1147_v51 = vrot.slane %v1140_v34, %v4528_v43  ;;  %v1219_v60 = vpack.i.b16 %v1218_v15, %v1217_v29 }
 0x237   :  { %v1206_v54 = vcombine.low %v1197_v56, %v1205_v3  ;;  %v1634_v10 = vcombine.low %v1617_v53, %v1625_v14  ;;  %v4859_v9 = vcombine.high %v4836_v2, %v4840_v32  ;;  %v579_v27 = vrot.slane %v5690_v23, %v4517_v33 }
 0x238   :  { %v629_v11 = vrot.slane %v5688_v4, %v4517_v33  ;;  %v637_v63 = vrot.slane %v5689_v45, %v4517_v33  ;;  %v5691_v25 = vcombine.high %v4626_v16, %v4629_v19  ;;  %v1156_v55 = vcombine.low %v1147_v51, %v1155_v48 }
 0x239   :  { %v662_v35 = vcombine.low %v645_v44, %v653_v28  ;;  %v5692_v8 = vpack.i.b16 %v4586_v40, %v4580_v36  ;;  %v1877_v18 = vsel %vm1778_vm2, %v1216_v31, 0  ;;  %v1633_v12 = vrot.slane %v1626_v52, %v4528_v43 }
 0x23a   :  { %v587_v26 = vrot.slane %v5691_v25, %v4517_v33  ;;  %v1641_v13 = vrot.slane %v1634_v10, %v4528_v43  ;;  %v612_v16 = vcombine.low %v4681_v24, %v603_v1  ;;  %v1924_v19 = vsel %vm1778_vm2, %v1219_v60, 0 }
 0x23b   :  { %3973 = vmatmul.mubr.msk.bf16.vlgmr.msra.gmra.mrb[0].mxu1 %vm1778_vm2, %v5692_v8  ;;  %3979 = vmatmul.mubr.msk.bf16.vlgmr.msra.gmra.mrb[4].mxu0 %vm1778_vm2, %v4598_v49  ;;  %v1224_v36 = vshrl.u32 %v1206_v54, 16  ;;  %v654_v40 = vcombine.low %v629_v11, %v637_v63  ;;  %v1223_v6 = vshrl.u32 %v1156_v55, 16  ;;  %v669_v42 = vrot.slane %v662_v35, %v4528_v43 }
 0x23c   :  { %3983 = vmatpush3.bf16.xpose.msra.mxu1 %v1877_v18  ;;  %3984 = vmatprep.mubr.msk.bf16.mxu1 %vm4398_vm1, %v5686_v20  ;;  %v4883_v57 = vcombine.high %v1633_v12, %v1641_v13  ;;  %v604_v22 = vcombine.low %v579_v27, %v587_v26  ;;  %v1222_v24 = vpack.i.b16 %v1206_v54, %v1156_v55  ;;  %v1756_v5 = vshrl.u32 %v4859_v9, 16  ;;  %v4940_v26 = vld [vmem:[%s5683_s5 + $0x8] sm:$0xff] }
 0x23d   :  { %3994 = vmatprep.subr.bf16.mxu1 %v5686_v20  ;;  %3989 = vmatpush3.bf16.xpose.msra.mxu0 %v1924_v19  ;;  %v619_v17 = vrot.slane %v612_v16, %v4528_v43  ;;  %v1225_v61 = vpack.i.b16 %v1224_v36, %v1223_v6  ;;  %v661_v38 = vrot.slane %v654_v40, %v4528_v43 }
 0x23e   :  { %3990 = vmatprep.mubr.msk.bf16.mxu0 %vm4398_vm1, %v5686_v20  ;;  %4000 = vmatprep.subr.bf16.mxu0 %v5686_v20  ;;  %v1754_v49 = vpack.i.b16 %v4883_v57, %v4859_v9  ;;  %v1757_v21 = vshrl.u32 %v4883_v57, 16  ;;  %v1207_v58 = vcombine.high %v1197_v56, %v1205_v3  ;;  %v5693_v44 = vpack.i.b16 %v4588_v41, %v4582_v37 }
 0x23f   :  { %v1971_v28 = vsel %vm1778_vm2, %v1222_v24, 0  ;;  %v611_v29 = vrot.slane %v604_v22, %v4528_v43  ;;  %v670_v34 = vcombine.low %v661_v38, %v669_v42  ;;  %v1157_v47 = vcombine.high %v1147_v51, %v1155_v48 }
 0x240   :  { %v4895_v46 = vpack.i.b16 %v1757_v21, %v1756_v5  ;;  %v2018_v15 = vsel %vm1778_vm2, %v1225_v61, 0  ;;  %v1230_v37 = vshrl.u32 %v1207_v58, 16  ;;  %v671_v52 = vcombine.high %v661_v38, %v669_v42 }
 0x241   :  { %v620_v3 = vcombine.low %v611_v29, %v619_v17  ;;  %v1228_v41 = vpack.i.b16 %v1207_v58, %v1157_v47  ;;  %v688_v62 = vshrl.u32 %v670_v34, 16  ;;  %v1229_v31 = vshrl.u32 %v1157_v47, 16 }
 0x242   :  { %v1642_v1 = vcombine.low %v1633_v12, %v1641_v13  ;;  %v621_v11 = vcombine.high %v611_v29, %v619_v17  ;;  %v1592_v45 = vcombine.low %v4836_v2, %v4840_v32  ;;  %v694_v63 = vshrl.u32 %v671_v52, 16  ;;  %v4935_v2 = vld [vmem:[%s5683_s5] sm:$0xff]  ;;  %s4399_s5 = smov 16  }
 0x243   :  { %3985 = vmatmul.mubr.msk.bf16.vlgmr.msra.gmra.mrb[4].mxu1 %vm1778_vm2, %v5693_v44  ;;  %v686_v48 = vpack.i.b16 %v670_v34, %v620_v3  ;;  %v687_v56 = vshrl.u32 %v620_v3, 16  ;;  %v1231_v53 = vpack.i.b16 %v1230_v37, %v1229_v31 }
 0x244   :  { %3995 = vmatpush3.bf16.xpose.msra.mxu1 %v1971_v28  ;;  %3996 = vmatprep.mubr.msk.bf16.mxu1 %vm4398_vm1, %v5686_v20  ;;  %v1749_v51 = vshrl.u32 %v1642_v1, 16  ;;  %v692_v60 = vpack.i.b16 %v671_v52, %v621_v11  ;;  %v693_v54 = vshrl.u32 %v621_v11, 16  ;;  %v1746_v10 = vpack.i.b16 %v1642_v1, %v1592_v45 }
 0x245   :  { %3991 = vmatmul.mubr.msk.bf16.vlgmr.msra.gmra.mrb[8].mxu0 %vm1778_vm2, %v4600_v50  ;;  %4006 = vmatprep.subr.bf16.mxu1 %v5686_v20  ;;  %v2065_v50 = vsel %vm1778_vm2, %v1228_v41, 0  ;;  %v689_v14 = vpack.i.b16 %v688_v62, %v687_v56  ;;  %v2112_v4 = vsel %vm1778_vm2, %v1231_v53, 0  ;;  %v1748_v23 = vshrl.u32 %v1592_v45, 16 }
 0x246   :  { %4001 = vmatpush3.bf16.xpose.msra.mxu0 %v2018_v15  ;;  %4002 = vmatprep.mubr.msk.bf16.mxu0 %vm4398_vm1, %v5686_v20  ;;  %v695_v27 = vpack.i.b16 %v694_v63, %v693_v54 }
 0x247   :  { %4012 = vmatprep.subr.bf16.mxu0 %v5686_v20  ;;  %v1750_v25 = vpack.i.b16 %v1749_v51, %v1748_v23 }
 0x24b   :  { %3997 = vmatmul.mubr.msk.bf16.vlgmr.msra.gmra.mrb[8].mxu1 %vm1778_vm2, %v686_v48 }
 0x24c   :  { %4007 = vmatpush3.bf16.xpose.msra.mxu1 %v2065_v50  ;;  %4008 = vmatprep.mubr.msk.bf16.mxu1 %vm4398_vm1, %v5686_v20 }
 0x24d   :  { %4003 = vmatmul.mubr.msk.bf16.vlgmr.msra.gmra.mrb[12].mxu0 %vm1778_vm2, %v689_v14  ;;  %4018 = vmatprep.subr.bf16.mxu1 %v5686_v20 }
 0x24e   :  { %4013 = vmatpush3.bf16.xpose.msra.mxu0 %v2112_v4  ;;  %4014 = vmatprep.mubr.msk.bf16.mxu0 %vm4398_vm1, %v5686_v20 }
 0x24f   :  { %4024 = vmatprep.subr.bf16.mxu0 %v5686_v20 }
 0x253   :  { %4009 = vmatmul.mubr.msk.bf16.vlgmr.msra.gmra.mrb[12].mxu1 %vm1778_vm2, %v692_v60 }
 0x254   :  { %4019 = vmatpush3.bf16.msra.mxu1 %v1746_v10  ;;  %4020 = vmatprep.mubr.msk.bf16.mxu1 %vm4398_vm1, %v5686_v20 }
 0x255   :  { %4015 = vmatmul.mubr.msk.bf16.vlgmr.msra.gmra.mrb[16].mxu0 %vm1778_vm2, %v695_v27  ;;  %4030 = vmatprep.subr.bf16.mxu1 %v5686_v20 }
 0x256   :  { %4025 = vmatpush3.bf16.msra.mxu0 %v1750_v25  ;;  %4026 = vmatprep.mubr.msk.bf16.mxu0 %vm4398_vm1, %v5686_v20 }
 0x257   :  { %4036 = vmatprep.subr.bf16.mxu0 %v5686_v20 }
 0x30e   :  { %v1819_v32 = vpop.f32.mrb[0].mxu1  ;;  %v1866_v18 = vpop.f32.mrb[4].mxu0 }
 0x30f   :  { %v4943_v55 = vadd.f32 %v1819_v32, %v4935_v2  ;;  %v3974_v35 = vpop.f32.mrb[1].mxu1  ;;  %v4949_v13 = vadd.f32 %v1866_v18, %v4935_v2  ;;  %v3980_v19 = vpop.f32.mrb[5].mxu0 }
 0x310   :  { %v1822_v8 = vpop.f32.mrb[2].mxu1  ;;  %v1869_v40 = vpop.f32.mrb[6].mxu0 }
 0x311   :  { %v4946_v12 = vadd.f32 %v1822_v8, %v4940_v26  ;;  %v3975_v16 = vpop.f32.mrb[3].mxu1  ;;  %v2156_v36 = vsel %vm2155_vm3, %v4943_v55, -inf  ;;  %v3981_v22 = vpop.f32.mrb[7].mxu0  ;;  %v4956_v42 = vadd.f32 %v1869_v40, %v4940_v26  ;;  %v2162_v24 = vsel %vm2155_vm3, %v4949_v13, -inf }
 0x312   :  { %2157 = vmax.xlane.f32.xlu0 %v2156_v36 }
 0x313   :  { %v2159_v6 = vsel %vm2155_vm3, %v4946_v12, -inf  ;;  %v2165_v34 = vsel %vm2155_vm3, %v4956_v42, -inf }
 0x314   :  { %2160 = vmax.xlane.f32.xlu1 %v2159_v6 }
 0x316   :  { %2163 = vmax.xlane.f32.xlu0 %v2162_v24  ;;  %v1913_v5 = vpop.f32.mrb[4].mxu1 }
 0x317   :  { %v4961_v21 = vadd.f32 %v1913_v5, %v4935_v2  ;;  %v3986_v17 = vpop.f32.mrb[5].mxu1 }
 0x318   :  { %v1916_v61 = vpop.f32.mrb[6].mxu1  ;;  %v1960_v38 = vpop.f32.mrb[8].mxu0 }
 0x319   :  { %v4964_v58 = vadd.f32 %v1916_v61, %v4940_v26  ;;  %v4967_v44 = vadd.f32 %v1960_v38, %v4935_v2  ;;  %v3987_v28 = vpop.f32.mrb[7].mxu1  ;;  %v3992_v29 = vpop.f32.mrb[9].mxu0  ;;  %v2168_v47 = vsel %vm2155_vm3, %v4961_v21, -inf }
 0x31a   :  { %v1963_v15 = vpop.f32.mrb[10].mxu0  ;;  %2166 = vmax.xlane.f32.xlu0 %v2165_v34  ;;  %2169 = vmax.xlane.f32.xlu1 %v2168_v47 }
 0x31b   :  { %v3993_v3 = vpop.f32.mrb[11].mxu0  ;;  %v4974_v37 = vadd.f32 %v1963_v15, %v4940_v26  ;;  %v2174_v41 = vsel %vm2155_vm3, %v4967_v44, -inf  ;;  %v2171_v62 = vsel %vm2155_vm3, %v4964_v58, -inf }
 0x31d   :  { %v2177_v11 = vsel %vm2155_vm3, %v4974_v37, -inf }
 0x31e   :  { %2175 = vmax.xlane.f32.xlu1 %v2174_v41  ;;  %2172 = vmax.xlane.f32.xlu0 %v2171_v62  ;;  %v2007_v31 = vpop.f32.mrb[8].mxu1 }
 0x31f   :  { %v4981_v48 = vadd.f32 %v2007_v31, %v4935_v2  ;;  %v3998_v56 = vpop.f32.mrb[9].mxu1 }
 0x320   :  { %v2010_v53 = vpop.f32.mrb[10].mxu1  ;;  %v2054_v50 = vpop.f32.mrb[12].mxu0 }
 0x321   :  { %v4984_v14 = vadd.f32 %v2010_v53, %v4940_v26  ;;  %v4987_v52 = vadd.f32 %v2054_v50, %v4935_v2  ;;  %v3999_v1 = vpop.f32.mrb[11].mxu1  ;;  %v4004_v4 = vpop.f32.mrb[13].mxu0  ;;  %v2180_v45 = vsel %vm2155_vm3, %v4981_v48, -inf }
 0x322   :  { %v2057_v63 = vpop.f32.mrb[14].mxu0  ;;  %2178 = vmax.xlane.f32.xlu0 %v2177_v11  ;;  %2181 = vmax.xlane.f32.xlu1 %v2180_v45 }
 0x323   :  { %v4005_v51 = vpop.f32.mrb[15].mxu0  ;;  %v4994_v60 = vadd.f32 %v2057_v63, %v4940_v26  ;;  %v2186_v54 = vsel %vm2155_vm3, %v4987_v52, -inf  ;;  %v2183_v10 = vsel %vm2155_vm3, %v4984_v14, -inf }
 0x325   :  { %v2189_v36 = vsel %vm2155_vm3, %v4994_v60, -inf }
 0x326   :  { %2187 = vmax.xlane.f32.xlu1 %v2186_v54  ;;  %2184 = vmax.xlane.f32.xlu0 %v2183_v10  ;;  %v2101_v23 = vpop.f32.mrb[12].mxu1 }
 0x327   :  { %v5001_v27 = vadd.f32 %v2101_v23, %v4935_v2  ;;  %v4010_v25 = vpop.f32.mrb[13].mxu1 }
 0x328   :  { %v2104_v32 = vpop.f32.mrb[14].mxu1  ;;  %v2148_v35 = vpop.f32.mrb[16].mxu0 }
 0x329   :  { %v5004_v8 = vadd.f32 %v2104_v32, %v4940_v26  ;;  %v5007_v18 = vadd.f32 %v2148_v35, %v4935_v2  ;;  %v4011_v16 = vpop.f32.mrb[15].mxu1  ;;  %v4016_v19 = vpop.f32.mrb[17].mxu0  ;;  %v2192_v40 = vsel %vm2155_vm3, %v5001_v27, -inf }
 0x32a   :  { %v2151_v22 = vpop.f32.mrb[18].mxu0  ;;  %2190 = vmax.xlane.f32.xlu0 %v2189_v36  ;;  %2193 = vmax.xlane.f32.xlu1 %v2192_v40 }
 0x32b   :  { %v4017_v6 = vpop.f32.mrb[19].mxu0  ;;  %v5014_v24 = vadd.f32 %v2151_v22, %v4940_v26  ;;  %v2198_v5 = vsel %vm2155_vm3, %v5007_v18, -inf  ;;  %v2195_v2 = vsel %vm2155_vm3, %v5004_v8, -inf }
 0x32d   :  { %v2201_v17 = vsel %vm2155_vm3, %v5014_v24, -inf }
 0x32e   :  { %2199 = vmax.xlane.f32.xlu1 %v2198_v5  ;;  %2196 = vmax.xlane.f32.xlu0 %v2195_v2 }
 0x332   :  { %2202 = vmax.xlane.f32.xlu0 %v2201_v17 }
 0x33f   :  { %1242 = vrot.lane.b32.xlu1 %v4548_v0, %s4384_s11 }
 0x348   :  { %1238 = vrot.lane.b32.xlu0 %v4523_v39, %s4384_s11 }
 0x39f   :  { %v2158_v26 = vpop.xlane.xlu0 %2157 }
 0x3a0   :  { %v2204_v61 = vsub.f32 %v4943_v55, %v2158_v26 }
 0x3a1   :  { %v2161_v38 = vpop.xlane.xlu1 %2160 }
 0x3a2   :  { %v2220_v28 = vmul.f32 1.442695, %v2204_v61  ;;  %v2205_v29 = vsub.f32 %v4946_v12, %v2161_v38 }
 0x3a3   :  { %v2164_v34 = vpop.xlane.xlu0 %2163 }
 0x3a4   :  { %4201 = vpow2.f32 %v2220_v28  ;;  %v2222_v47 = vmul.f32 1.442695, %v2205_v29  ;;  %v2206_v15 = vsub.f32 %v4949_v13, %v2164_v34 }
 0x3a6   :  { %4203 = vpow2.f32 %v2222_v47  ;;  %v2224_v3 = vmul.f32 1.442695, %v2206_v15 }
 0x3a7   :  { %v2167_v41 = vpop.xlane.xlu0 %2166  ;;  %v2170_v62 = vpop.xlane.xlu1 %2169 }
 0x3a8   :  { %4205 = vpow2.f32 %v2224_v3  ;;  %v2207_v0 = vsub.f32 %v4956_v42, %v2167_v41  ;;  %v2208_v39 = vsub.f32 %v4961_v21, %v2170_v62 }
 0x3aa   :  { %v2226_v31 = vmul.f32 1.442695, %v2207_v0  ;;  %v2228_v55 = vmul.f32 1.442695, %v2208_v39 }
 0x3ab   :  { %v2176_v56 = vpop.xlane.xlu1 %2175  ;;  %v2173_v53 = vpop.xlane.xlu0 %2172 }
 0x3ac   :  { %4207 = vpow2.f32 %v2226_v31  ;;  %v2210_v12 = vsub.f32 %v4967_v44, %v2176_v56  ;;  %v2209_v50 = vsub.f32 %v4964_v58, %v2173_v53 }
 0x3ad   :  { %4209 = vpow2.f32 %v2228_v55 }
 0x3ae   :  { %v5033_v13 = vpop.eup %4201  ;;  %v2232_v1 = vmul.f32 1.442695, %v2210_v12  ;;  %v2230_v4 = vmul.f32 1.442695, %v2209_v50 }
 0x3af   :  { %v2179_v11 = vpop.xlane.xlu0 %2178  ;;  %v2182_v45 = vpop.xlane.xlu1 %2181  ;;  %v2252_v42 = vsel %vm2155_vm3, %v5033_v13, 0.0 }
 0x3b0   :  { %v5037_v21 = vpop.eup %4203  ;;  %4211 = vpow2.f32 %v2232_v1  ;;  %v2211_v63 = vsub.f32 %v4974_v37, %v2179_v11  ;;  %v2212_v51 = vsub.f32 %v4981_v48, %v2182_v45  ;;  %2253 = vadd.xlane.f32.xlu0 %v2252_v42 }
 0x3b1   :  { %4213 = vpow2.f32 %v2230_v4  ;;  %v2255_v58 = vsel %vm2155_vm3, %v5037_v21, 0.0 }
 0x3b2   :  { %v5043_v44 = vpop.eup %4205  ;;  %v2234_v54 = vmul.f32 1.442695, %v2211_v63  ;;  %2256 = vadd.xlane.f32.xlu1 %v2255_v58  ;;  %v2236_v10 = vmul.f32 1.442695, %v2212_v51 }
 0x3b3   :  { %v2188_v23 = vpop.xlane.xlu1 %2187  ;;  %v2185_v25 = vpop.xlane.xlu0 %2184  ;;  %v2258_v32 = vsel %vm2155_vm3, %v5043_v44, 0.0 }
 0x3b4   :  { %4215 = vpow2.f32 %v2234_v54  ;;  %v2214_v37 = vsub.f32 %v4987_v52, %v2188_v23  ;;  %2259 = vadd.xlane.f32.xlu0 %v2258_v32  ;;  %v2213_v53 = vsub.f32 %v4984_v14, %v2185_v25 }
 0x3b5   :  { %4217 = vpow2.f32 %v2236_v10 }
 0x3b6   :  { %v5048_v48 = vpop.eup %4207  ;;  %v2240_v16 = vmul.f32 1.442695, %v2214_v37  ;;  %v2238_v12 = vmul.f32 1.442695, %v2213_v53 }
 0x3b7   :  { %v5050_v35 = vpop.eup %4209  ;;  %v2191_v19 = vpop.xlane.xlu0 %2190  ;;  %v2261_v36 = vsel %vm2155_vm3, %v5048_v48, 0.0 }
 0x3b8   :  { %v2215_v40 = vsub.f32 %v4994_v60, %v2191_v19  ;;  %v2264_v22 = vsel %vm2155_vm3, %v5050_v35, 0.0  ;;  %2262 = vadd.xlane.f32.xlu0 %v2261_v36  ;;  %4219 = vpow2.f32 %v2240_v16  ;;  %v2194_v56 = vpop.xlane.xlu1 %2193  ;;  %v1268_v36 = vshrl.u32 %v4712_v7, 16 }
 0x3b9   :  { %2265 = vadd.xlane.f32.xlu1 %v2264_v22  ;;  %v2216_v50 = vsub.f32 %v5001_v27, %v2194_v56 }
 0x3ba   :  { %v5057_v6 = vpop.eup %4211  ;;  %v2242_v5 = vmul.f32 1.442695, %v2215_v40 }
 0x3bb   :  { %v5059_v52 = vpop.eup %4213  ;;  %v2197_v2 = vpop.xlane.xlu0 %2196  ;;  %v2270_v17 = vsel %vm2155_vm3, %v5057_v6, 0.0  ;;  %v2244_v4 = vmul.f32 1.442695, %v2216_v50 }
 0x3bc   :  { %v2217_v26 = vsub.f32 %v5004_v8, %v2197_v2  ;;  %v2267_v60 = vsel %vm2155_vm3, %v5059_v52, 0.0  ;;  %4221 = vpow2.f32 %v2242_v5  ;;  %v2200_v1 = vpop.xlane.xlu1 %2199 }
 0x3bd   :  { %2271 = vadd.xlane.f32.xlu1 %v2270_v17  ;;  %2268 = vadd.xlane.f32.xlu0 %v2267_v60 }
 0x3be   :  { %v5066_v61 = vpop.eup %4215  ;;  %v2246_v38 = vmul.f32 1.442695, %v2217_v26 }
 0x3bf   :  { %v2203_v28 = vpop.xlane.xlu0 %2202  ;;  %v2273_v29 = vsel %vm2155_vm3, %v5066_v61, 0.0  ;;  %v5071_v47 = vpop.eup %4217 }
 0x3c0   :  { %v2219_v34 = vsub.f32 %v5014_v24, %v2203_v28  ;;  %4223 = vpow2.f32 %v2246_v38  ;;  %v2276_v15 = vsel %vm2155_vm3, %v5071_v47, 0.0  ;;  %v1243_v58 = vpop.permute.xlu1 %1242 }
 0x3c1   :  { %2274 = vadd.xlane.f32.xlu0 %v2273_v29 }
 0x3c2   :  { %v2250_v8 = vmul.f32 1.442695, %v2219_v34  ;;  %v5075_v3 = vpop.eup %4219 }
 0x3c3   :  { %v2282_v41 = vsel %vm2155_vm3, %v5075_v3, 0.0  ;;  %v1239_v51 = vpop.permute.xlu0 %1238 }
 0x3c4   :  { %4225 = vpow2.f32 %v2250_v8  ;;  %v1269_v16 = vshrl.u32 %v1239_v51, 16  ;;  %v1266_v40 = vpack.i.b16 %v1239_v51, %v4712_v7  ;;  %v1276_v7 = vshrl.u32 %v1243_v58, 16 }
 0x3c5   :  { %2277 = vadd.xlane.f32.xlu0 %v2276_v15  ;;  %4227 = vpow2.f32 %v2238_v12 }
 0x3c6   :  { %v5079_v62 = vpop.eup %4221  ;;  %4229 = vpow2.f32 %v2244_v4  ;;  %v1270_v26 = vpack.i.b16 %v1269_v16, %v1268_v36  ;;  %v1412_v38 = vcombine.high %v1266_v40, %v4513_v30 }
 0x3c7   :  { %v2285_v24 = vsel %vm2155_vm3, %v5079_v62, 0.0 }
 0x3c8   :  { %v1426_v12 = vrot.slane %v1412_v38, %v4517_v33  ;;  %v1485_v50 = vrot.slane %v1270_v26, %v4517_v33 }
 0x3c9   :  { %2283 = vadd.xlane.f32.xlu0 %v2282_v41  ;;  %v1478_v41 = vcombine.high %v1270_v26, %v4513_v30 }
 0x3ca   :  { %v5083_v0 = vpop.eup %4223 }
 0x3cb   :  { %v2291_v39 = vsel %vm2155_vm3, %v5083_v0, 0.0 }
 0x3cd   :  { %2286 = vadd.xlane.f32.xlu0 %v2285_v24 }
 0x3ce   :  { %1246 = vrot.lane.b32.xlu1 %v4544_v59, %s4384_s11  ;;  %v5089_v31 = vpop.eup %4225  ;;  %v2218_v59 = vsub.f32 %v5007_v18, %v2200_v1 }
 0x3cf   :  { %v2297_v55 = vsel %vm2155_vm3, %v5089_v31, 0.0  ;;  %v5096_v45 = vpop.eup %4227 }
 0x3d0   :  { %v2248_v11 = vmul.f32 1.442695, %v2218_v59  ;;  %v2279_v42 = vsel %vm2155_vm3, %v5096_v45, 0.0  ;;  %v5100_v63 = vpop.eup %4229 }
 0x3d1   :  { %2292 = vadd.xlane.f32.xlu0 %v2291_v39  ;;  %v2288_v14 = vsel %vm2155_vm3, %v5100_v63, 0.0 }
 0x3d2   :  { %4231 = vpow2.f32 %v2248_v11  ;;  %v1492_v11 = vrot.slane %v1478_v41, %v4517_v33 }
 0x3d5   :  { %2298 = vadd.xlane.f32.xlu0 %v2297_v55 }
 0x3dc   :  { %v5104_v27 = vpop.eup %4231 }
 0x3dd   :  { %v2294_v18 = vsel %vm2155_vm3, %v5104_v27, 0.0 }
 0x3f2   :  { %2280 = vadd.xlane.f32.xlu1 %v2279_v42 }
 0x3f6   :  { %2289 = vadd.xlane.f32.xlu1 %v2288_v14 }
 0x3fa   :  { %2295 = vadd.xlane.f32.xlu1 %v2294_v18 }
 0x43d   :  { %v2254_v54 = vpop.xlane.xlu0 %2253 }
 0x43e   :  { %4233 = vrcp.f32 %v2254_v54 }
 0x43f   :  { %v2257_v10 = vpop.xlane.xlu1 %2256 }
 0x440   :  { %4235 = vrcp.f32 %v2257_v10 }
 0x441   :  { %v2260_v23 = vpop.xlane.xlu0 %2259 }
 0x442   :  { %4237 = vrcp.f32 %v2260_v23 }
 0x445   :  { %v2263_v25 = vpop.xlane.xlu0 %2262 }
 0x446   :  { %v2266_v32 = vpop.xlane.xlu1 %2265  ;;  %4239 = vrcp.f32 %v2263_v25 }
 0x447   :  { %4241 = vrcp.f32 %v2266_v32 }
 0x448   :  { %v4234_v37 = vpop.eup %4233 }
 0x449   :  { %v5111_v2 = vmul.f32 %v4234_v37, %v5033_v13 }
 0x44a   :  { %v4236_v19 = vpop.eup %4235  ;;  %v2272_v22 = vpop.xlane.xlu1 %2271 }
 0x44b   :  { %v2269_v5 = vpop.xlane.xlu0 %2268  ;;  %v5114_v17 = vmul.f32 %v4236_v19, %v5037_v21  ;;  %4243 = vrcp.f32 %v2272_v22  ;;  %v1419_v21 = vrot.slane %v1266_v40, %v4517_v33 }
 0x44c   :  { %4245 = vrcp.f32 %v2269_v5  ;;  %v4238_v34 = vpop.eup %4237 }
 0x44d   :  { %v2777_v60 = vpack.c.bf16 %v5114_v17, %v5111_v2  ;;  %v5136_v9 = vmul.f32 %v4238_v34, %v5043_v44 }
 0x44e   :  { %v1247_v28 = vpop.permute.xlu1 %1246 }
 0x44f   :  { %v2275_v29 = vpop.xlane.xlu0 %2274  ;;  %v1274_v8 = vpack.i.b16 %v1247_v28, %v1243_v58  ;;  %v1277_v15 = vshrl.u32 %v1247_v28, 16  ;;  %4021 = vmatmul.mubr.msk.bf16.vlgmr.msra.gmra.mrb[16].mxu1 %vm2155_vm3, %v2777_v60 }
 0x450   :  { %4247 = vrcp.f32 %v2275_v29  ;;  %v4240_v13 = vpop.eup %4239  ;;  %4031 = vmatpush3.bf16.msra.mxu1 %v1754_v49  ;;  %4032 = vmatprep.mubr.msk.bf16.mxu1 %vm4398_vm1, %v5686_v20 }
 0x451   :  { %v4242_v24 = vpop.eup %4241  ;;  %v5128_v39 = vmul.f32 %v4240_v13, %v5048_v48  ;;  %v1278_v55 = vpack.i.b16 %v1277_v15, %v1276_v7  ;;  %v1427_v56 = vcombine.high %v1274_v8, %v4513_v30  ;;  %v1434_v53 = vrot.slane %v1274_v8, %v4517_v33  ;;  %4042 = vmatprep.subr.bf16.mxu1 %v5686_v20 }
 0x452   :  { %v5139_v57 = vmul.f32 %v4242_v24, %v5050_v35 }
 0x453   :  { %v5141_v49 = vpop.xlane.xlu0 %2277  ;;  %v1441_v48 = vrot.slane %v1427_v56, %v4517_v33  ;;  %v1442_v1 = vcombine.low %v1419_v21, %v1434_v53  ;;  %v1443_v4 = vcombine.high %v1419_v21, %v1434_v53  ;;  %v1493_v59 = vcombine.high %v1278_v55, %v4513_v30 }
 0x454   :  { %v1500_v42 = vrot.slane %v1278_v55, %v4517_v33  ;;  %v2778_v14 = vpack.c.bf16 %v5128_v39, %v5136_v9  ;;  %v2332_v44 = vcombine.low %v5111_v2, %v5139_v57 }
 0x455   :  { %v4244_v35 = vpop.eup %4243  ;;  %v1450_v18 = vrot.slane %v1442_v1, %v4528_v43  ;;  %v1457_v51 = vrot.slane %v1443_v4, %v4528_v43  ;;  %v1458_v58 = vcombine.low %v1426_v12, %v1441_v48  ;;  %v1459_v54 = vcombine.high %v1426_v12, %v1441_v48 }
 0x456   :  { %v4246_v10 = vpop.eup %4245  ;;  %v5154_v30 = vmul.f32 %v4244_v35, %v5057_v6  ;;  %v1507_v23 = vrot.slane %v1493_v59, %v4517_v33  ;;  %v1508_v25 = vcombine.low %v1485_v50, %v1500_v42  ;;  %v1509_v32 = vcombine.high %v1485_v50, %v1500_v42  ;;  %4027 = vmatmul.mubr.msk.bf16.vlgmr.msra.gmra.mrb[20].mxu0 %vm2155_vm3, %v2778_v14 }
 0x457   :  { %v2284_v37 = vpop.xlane.xlu0 %2283  ;;  %v5159_v16 = vmul.f32 %v4246_v10, %v5059_v52  ;;  %v1466_v19 = vrot.slane %v1458_v58, %v4528_v43  ;;  %v1473_v36 = vrot.slane %v1459_v54, %v4528_v43  ;;  %v1644_v40 = vcombine.low %v1450_v18, %v1457_v51  ;;  %4037 = vmatpush3.bf16.msra.mxu0 %v4895_v46 }
 0x458   :  { %v1516_v6 = vrot.slane %v1508_v25, %v4528_v43  ;;  %v1523_v22 = vrot.slane %v1509_v32, %v4528_v43  ;;  %v1524_v5 = vcombine.low %v1492_v11, %v1507_v23  ;;  %v1525_v26 = vcombine.high %v1492_v11, %v1507_v23  ;;  %4038 = vmatprep.mubr.msk.bf16.mxu0 %vm4398_vm1, %v5686_v20 }
 0x459   :  { %v1651_v52 = vrot.slane %v1644_v40, %v4517_v33  ;;  %v3885_v38 = vcombine.high %v1450_v18, %v1457_v51  ;;  %v1660_v28 = vcombine.low %v1466_v19, %v1473_v36  ;;  %v3886_v29 = vcombine.high %v1466_v19, %v1473_v36  ;;  %4048 = vmatprep.subr.bf16.mxu0 %v5686_v20 }
 0x45a   :  { %v4248_v60 = vpop.eup %4247  ;;  %v1532_v34 = vrot.slane %v1524_v5, %v4528_v43  ;;  %v1539_v46 = vrot.slane %v1525_v26, %v4528_v43  ;;  %v1694_v7 = vcombine.low %v1516_v6, %v1523_v22  ;;  %v3887_v8 = vcombine.high %v1516_v6, %v1523_v22 }
 0x45b   :  { %v2287_v15 = vpop.xlane.xlu0 %2286  ;;  %v1659_v13 = vrot.slane %v3885_v38, %v4517_v33  ;;  %v1667_v21 = vrot.slane %v1660_v28, %v4517_v33  ;;  %v1675_v41 = vrot.slane %v3886_v29, %v4517_v33  ;;  %v5176_v24 = vmul.f32 %v4248_v60, %v5066_v61 }
 0x45c   :  { %v1701_v55 = vrot.slane %v1694_v7, %v4517_v33  ;;  %v1709_v56 = vrot.slane %v3887_v8, %v4517_v33  ;;  %v1710_v53 = vcombine.low %v1532_v34, %v1539_v46  ;;  %v3888_v12 = vcombine.high %v1532_v34, %v1539_v46 }
 0x45d   :  { %4249 = vrcp.f32 %v2284_v37  ;;  %v2779_v50 = vpack.c.bf16 %v5159_v16, %v5139_v57  ;;  %v2780_v48 = vpack.c.bf16 %v5176_v24, %v5154_v30  ;;  %v1676_v1 = vcombine.low %v1651_v52, %v1659_v13 }
 0x45e   :  { %4251 = vrcp.f32 %v2287_v15  ;;  %v1684_v59 = vcombine.low %v1667_v21, %v1675_v41  ;;  %v1717_v61 = vrot.slane %v1710_v53, %v4517_v33  ;;  %v1725_v11 = vrot.slane %v3888_v12, %v4517_v33 }
 0x45f   :  { %v5184_v4 = vpop.xlane.xlu0 %2292  ;;  %4033 = vmatmul.mubr.msk.bf16.vlgmr.msra.gmra.mrb[20].mxu1 %vm2155_vm3, %v2779_v50  ;;  %4039 = vmatmul.mubr.msk.bf16.vlgmr.msra.gmra.mrb[24].mxu0 %vm2155_vm3, %v2780_v48  ;;  %v1683_v42 = vrot.slane %v1676_v1, %v4528_v43  ;;  %v1726_v14 = vcombine.low %v1701_v55, %v1709_v56  ;;  %v2400_v51 = vcombine.low %v5114_v17, %v5159_v16 }
 0x460   :  { %v1691_v35 = vrot.slane %v1684_v59, %v4528_v43  ;;  %v1734_v18 = vcombine.low %v1717_v61, %v1725_v11  ;;  %4050 = vmatprep.mubr.msk.bf16.mxu0 %vm4398_vm1, %v5686_v20  ;;  %4044 = vmatprep.mubr.msk.bf16.mxu1 %vm4398_vm1, %v5686_v20  ;;  %v2416_v54 = vcombine.low %v5128_v39, %v5176_v24 }
 0x461   :  { %v1733_v58 = vrot.slane %v1726_v14, %v4528_v43  ;;  %v2348_v10 = vcombine.low %v5136_v9, %v5154_v30  ;;  %v5205_v37 = vrot.slane %v2400_v51, %v4517_v33  ;;  %v5211_v19 = vrot.slane %v2332_v44, %v4517_v33 }
 0x462   :  { %v1692_v25 = vcombine.low %v1683_v42, %v1691_v35  ;;  %v1741_v32 = vrot.slane %v1734_v18, %v4528_v43  ;;  %v5214_v36 = vrot.slane %v2416_v54, %v4517_v33  ;;  %v2401_v6 = vcombine.high %v5114_v17, %v5159_v16 }
 0x463   :  { %v2299_v23 = vpop.xlane.xlu0 %2298  ;;  %v5217_v40 = vrot.slane %v2348_v10, %v4517_v33  ;;  %v1693_v34 = vcombine.high %v1683_v42, %v1691_v35  ;;  %v2417_v21 = vcombine.high %v5128_v39, %v5176_v24  ;;  %v2333_v41 = vcombine.high %v5111_v2, %v5139_v57 }
 0x464   :  { %4253 = vrcp.f32 %v2299_v23  ;;  %v1742_v22 = vcombine.low %v1733_v58, %v1741_v32  ;;  %v5221_v5 = vcombine.high %v1733_v58, %v1741_v32  ;;  %v2433_v60 = vcombine.high %v5205_v37, %v5214_v36 }
 0x465   :  { %v2365_v52 = vcombine.high %v5211_v19, %v5217_v40  ;;  %v1764_v28 = vshrl.u32 %v1692_v25, 16  ;;  %v1772_v13 = vshrl.u32 %v1693_v34, 16  ;;  %v2431_v53 = vrot.slane %v2417_v21, %v4517_v33 }
 0x466   :  { %v1762_v38 = vpack.i.b16 %v1742_v22, %v1692_v25  ;;  %v1765_v29 = vshrl.u32 %v1742_v22, 16  ;;  %v1773_v7 = vshrl.u32 %v5221_v5, 16  ;;  %v5249_v39 = vrot.slane %v2333_v41, %v4517_v33 }
 0x467   :  { %v4250_v17 = vpop.eup %4249  ;;  %4255 = vrcp.f32 %v5141_v49  ;;  %v5272_v23 = vrot.slane %v2433_v60, %v4528_v43 }
 0x468   :  { %v4252_v16 = vpop.eup %4251  ;;  %4043 = vmatpush3.bf16.msra.mxu1 %v1762_v38  ;;  %v1766_v46 = vpack.i.b16 %v1765_v29, %v1764_v28  ;;  %v5233_v8 = vmul.f32 %v4250_v17, %v5075_v3  ;;  %v2349_v3 = vcombine.high %v5136_v9, %v5154_v30  ;;  %v1774_v56 = vpack.i.b16 %v1773_v7, %v1772_v13 }
 0x469   :  { %v2327_v15 = vmul.f32 %v4252_v16, %v5079_v62  ;;  %4054 = vmatprep.subr.bf16.mxu1 %v5686_v20  ;;  %v2415_v62 = vrot.slane %v2401_v6, %v4517_v33  ;;  %4257 = vrcp.f32 %v5184_v4  ;;  %v1770_v4 = vpack.i.b16 %v5221_v5, %v1693_v34 }
 0x46a   :  { %4049 = vmatpush3.bf16.msra.mxu0 %v1766_v46  ;;  %v5252_v2 = vrot.slane %v2349_v3, %v4517_v33  ;;  %v5300_v28 = vrot.slane %v2365_v52, %v4528_v43  ;;  %v5308_v7 = vcombine.high %v5272_v23, %v5686_v20 }
 0x46b   :  { %v2782_v55 = vpack.c.bf16 %v2327_v15, %v5233_v8  ;;  %4060 = vmatprep.subr.bf16.mxu0 %v5686_v20  ;;  %v2448_v9 = vcombine.low %v2415_v62, %v2431_v53  ;;  %v2449_v30 = vcombine.high %v2415_v62, %v2431_v53 }
 0x46c   :  { %v2380_v24 = vcombine.low %v5249_v39, %v5252_v2  ;;  %v2381_v50 = vcombine.high %v5249_v39, %v5252_v2 }
 0x46d   :  { %4051 = vmatmul.mubr.msk.bf16.vlgmr.msra.gmra.mrb[28].mxu0 %vm2155_vm3, %v2782_v55  ;;  %v5275_v25 = vrot.slane %v2448_v9, %v4528_v43  ;;  %v5290_v22 = vrot.slane %v2449_v30, %v4528_v43 }
 0x46e   :  { %v4254_v12 = vpop.eup %4253  ;;  %4061 = vmatpush3.bf16.msra.mxu0 %v1774_v56  ;;  %4062 = vmatprep.mubr.msk.bf16.mxu0 %vm4398_vm1, %v5686_v20 }
 0x46f   :  { %v5255_v57 = vmul.f32 %v4254_v12, %v5089_v31 }
 0x471   :  { %v2552_v48 = vcombine.low %v2327_v15, %v5255_v57  ;;  %v2553_v1 = vcombine.high %v2327_v15, %v5255_v57  ;;  %v4256_v61 = vpop.eup %4255  ;;  %v5312_v15 = vcombine.high %v5275_v25, %v5686_v20 }
 0x472   :  { %v2324_v35 = vmul.f32 %v4256_v61, %v5071_v47 }
 0x473   :  { %v4258_v42 = vpop.eup %4257  ;;  %v2567_v6 = vrot.slane %v2553_v1, %v4517_v33 }
 0x474   :  { %v2329_v18 = vmul.f32 %v4258_v42, %v5083_v0  ;;  %v5283_v0 = vrot.slane %v2552_v48, %v4517_v33  ;;  %v5367_v42 = vrot.slane %v2380_v24, %v4528_v43 }
 0x47f   :  { %v2281_v31 = vpop.xlane.xlu1 %2280 }
 0x480   :  { %4259 = vrcp.f32 %v2281_v31 }
 0x483   :  { %v2290_v59 = vpop.xlane.xlu1 %2289 }
 0x484   :  { %4261 = vrcp.f32 %v2290_v59 }
 0x487   :  { %v2296_v11 = vpop.xlane.xlu1 %2295 }
 0x488   :  { %4263 = vrcp.f32 %v2296_v11 }
 0x48a   :  { %v4260_v14 = vpop.eup %4259 }
 0x48b   :  { %v2325_v51 = vmul.f32 %v4260_v14, %v5096_v45  ;;  %v5373_v14 = vrot.slane %v2381_v50, %v4528_v43  ;;  %v5398_v50 = vcombine.high %v5367_v42, %v5686_v20 }
 0x48d   :  { %v2781_v58 = vpack.c.bf16 %v2325_v51, %v2324_v35  ;;  %v2536_v54 = vcombine.low %v2325_v51, %v2329_v18  ;;  %v2537_v49 = vcombine.high %v2325_v51, %v2329_v18 }
 0x48e   :  { %v4262_v10 = vpop.eup %4261 }
 0x48f   :  { %v2328_v32 = vmul.f32 %v4262_v10, %v5100_v63  ;;  %4045 = vmatmul.mubr.msk.bf16.vlgmr.msra.gmra.mrb[24].mxu1 %vm2155_vm3, %v2781_v58  ;;  %v5280_v47 = vrot.slane %v2536_v54, %v4517_v33  ;;  %v2551_v45 = vrot.slane %v2537_v49, %v4517_v33  ;;  %v5382_v54 = vcombine.high %v5300_v28, %v5686_v20 }
 0x490   :  { %4055 = vmatpush3.bf16.msra.mxu1 %v1770_v4  ;;  %4056 = vmatprep.mubr.msk.bf16.mxu1 %vm4398_vm1, %v5686_v20  ;;  %v5402_v10 = vcombine.high %v5373_v14, %v5686_v20 }
 0x491   :  { %v2568_v63 = vcombine.low %v5280_v47, %v5283_v0  ;;  %v2468_v5 = vcombine.low %v2324_v35, %v2328_v32  ;;  %v2569_v60 = vcombine.high %v5280_v47, %v5283_v0  ;;  %v2584_v29 = vcombine.low %v2551_v45, %v2567_v6 }
 0x492   :  { %v4264_v38 = vpop.eup %4263  ;;  %v2469_v34 = vcombine.high %v2324_v35, %v2328_v32  ;;  %v2585_v17 = vcombine.high %v2551_v45, %v2567_v6  ;;  %v2783_v13 = vpack.c.bf16 %v2329_v18, %v2328_v32  ;;  %v5694_v47 = vcombine.low %v5205_v37, %v5214_v36 }
 0x493   :  { %v2330_v16 = vmul.f32 %v4264_v38, %v5104_v27  ;;  %v5304_v46 = vrot.slane %v2569_v60, %v4528_v43  ;;  %v5315_v52 = vrot.slane %v2584_v29, %v4528_v43  ;;  %v5322_v27 = vcombine.high %v5290_v22, %v5686_v20 }
 0x494   :  { %v5318_v21 = vrot.slane %v2585_v17, %v4528_v43  ;;  %v5326_v55 = vrot.slane %v2468_v5, %v4517_v33  ;;  %v2483_v30 = vrot.slane %v2469_v34, %v4517_v33  ;;  %v5532_v0 = vrot.slane %v5694_v47, %v4528_v43 }
 0x495   :  { %v2784_v41 = vpack.c.bf16 %v5255_v57, %v2330_v16  ;;  %v2484_v3 = vcombine.low %v5233_v8, %v2330_v16  ;;  %v5333_v62 = vcombine.high %v5304_v46, %v5686_v20  ;;  %v5339_v12 = vcombine.high %v5315_v52, %v5686_v20 }
 0x496   :  { %v2485_v57 = vcombine.high %v5233_v8, %v2330_v16  ;;  %v5357_v59 = vcombine.high %v5318_v21, %v5686_v20 }
 0x497   :  { %4057 = vmatmul.mubr.msk.bf16.vlgmr.msra.gmra.mrb[28].mxu1 %vm2155_vm3, %v2783_v13  ;;  %4063 = vmatmul.mubr.msk.bf16.vlgmr.msra.gmra.mrb[32].mxu0 %vm2155_vm3, %v2784_v41  ;;  %v5345_v9 = vrot.slane %v2484_v3, %v4517_v33 }
 0x498   :  { %v2499_v31 = vrot.slane %v2485_v57, %v4517_v33 }
 0x499   :  { %v2500_v61 = vcombine.low %v5326_v55, %v5345_v9  ;;  %v2501_v11 = vcombine.high %v5326_v55, %v5345_v9 }
 0x49a   :  { %v2516_v35 = vcombine.low %v2483_v30, %v2499_v31  ;;  %v2517_v18 = vcombine.high %v2483_v30, %v2499_v31 }
 0x49b   :  { %v5378_v58 = vrot.slane %v2501_v11, %v4528_v43 }
 0x49c   :  { %v5385_v24 = vrot.slane %v2516_v35, %v4528_v43  ;;  %v5388_v49 = vrot.slane %v2517_v18, %v4528_v43 }
 0x49d   :  { %v5394_v2 = vcombine.high %v5378_v58, %v5686_v20 }
 0x49e   :  { %v5408_v32 = vcombine.high %v5385_v24, %v5686_v20  ;;  %v5414_v6 = vcombine.high %v5388_v49, %v5686_v20 }
 0x522   :  { %v2822_v29 = vpop.f32.mrb[16].mxu1 }
 0x523   :  { %v4022_v34 = vpop.f32.mrb[17].mxu1 }
 0x524   :  { %v2825_v17 = vpop.f32.mrb[18].mxu1 }
 0x525   :  { %v4023_v16 = vpop.f32.mrb[19].mxu1 }
 0x529   :  { %v2866_v13 = vpop.f32.mrb[20].mxu0 }
 0x52a   :  { %v4028_v41 = vpop.f32.mrb[21].mxu0 }
 0x52b   :  { %v2869_v3 = vpop.f32.mrb[22].mxu0 }
 0x52c   :  { %v4029_v57 = vpop.f32.mrb[23].mxu0 }
 0x532   :  { %v2910_v30 = vpop.f32.mrb[20].mxu1  ;;  %v2954_v31 = vpop.f32.mrb[24].mxu0 }
 0x533   :  { %v3137_v11 = vcombine.low %v2822_v29, %v2910_v30  ;;  %v3138_v35 = vcombine.high %v2822_v29, %v2910_v30  ;;  %v4034_v18 = vpop.f32.mrb[21].mxu1  ;;  %v3153_v51 = vcombine.low %v2866_v13, %v2954_v31  ;;  %v3154_v45 = vcombine.high %v2866_v13, %v2954_v31  ;;  %v4040_v48 = vpop.f32.mrb[25].mxu0 }
 0x534   :  { %v2913_v60 = vpop.f32.mrb[22].mxu1  ;;  %v2957_v8 = vpop.f32.mrb[26].mxu0 }
 0x535   :  { %v3145_v38 = vrot.slane %v3137_v11, %v4517_v33  ;;  %v3152_v34 = vrot.slane %v3138_v35, %v4517_v33  ;;  %v3205_v4 = vcombine.low %v2825_v17, %v2913_v60  ;;  %v3206_v16 = vcombine.high %v2825_v17, %v2913_v60  ;;  %v4035_v53 = vpop.f32.mrb[23].mxu1  ;;  %v4041_v41 = vpop.f32.mrb[27].mxu0 }
 0x536   :  { %v3161_v57 = vrot.slane %v3153_v51, %v4517_v33  ;;  %v3168_v5 = vrot.slane %v3154_v45, %v4517_v33  ;;  %v3221_v1 = vcombine.low %v2869_v3, %v2957_v8  ;;  %v3222_v29 = vcombine.high %v2869_v3, %v2957_v8 }
 0x537   :  { %v3213_v31 = vrot.slane %v3205_v4, %v4517_v33  ;;  %v3220_v11 = vrot.slane %v3206_v16, %v4517_v33 }
 0x538   :  { %v3169_v30 = vcombine.low %v3145_v38, %v3161_v57  ;;  %v3170_v18 = vcombine.high %v3145_v38, %v3161_v57  ;;  %v3185_v13 = vcombine.low %v3152_v34, %v3168_v5  ;;  %v3186_v48 = vcombine.high %v3152_v34, %v3168_v5 }
 0x539   :  { %v3229_v35 = vrot.slane %v3221_v1, %v4517_v33  ;;  %v3236_v60 = vrot.slane %v3222_v29, %v4517_v33 }
 0x53a   :  { %v3177_v53 = vrot.slane %v3169_v30, %v4528_v43  ;;  %v3184_v51 = vrot.slane %v3170_v18, %v4528_v43  ;;  %v3193_v45 = vrot.slane %v3185_v13, %v4528_v43  ;;  %v3200_v8 = vrot.slane %v3186_v48, %v4528_v43 }
 0x53b   :  { %v3237_v17 = vcombine.low %v3213_v31, %v3229_v35  ;;  %v3238_v38 = vcombine.high %v3213_v31, %v3229_v35  ;;  %v3253_v3 = vcombine.low %v3220_v11, %v3236_v60  ;;  %v3254_v5 = vcombine.high %v3220_v11, %v3236_v60 }
 0x53c   :  { %v3409_v34 = vcombine.low %v3177_v53, %v3184_v51  ;;  %v3909_v4 = vcombine.high %v3177_v53, %v3184_v51  ;;  %v3425_v41 = vcombine.low %v3193_v45, %v3200_v8  ;;  %v3910_v16 = vcombine.high %v3193_v45, %v3200_v8 }
 0x53d   :  { %v3245_v1 = vrot.slane %v3237_v17, %v4528_v43  ;;  %v3252_v57 = vrot.slane %v3238_v38, %v4528_v43  ;;  %v3261_v29 = vrot.slane %v3253_v3, %v4528_v43  ;;  %v3268_v30 = vrot.slane %v3254_v5, %v4528_v43 }
 0x53e   :  { %v3416_v18 = vrot.slane %v3409_v34, %v4517_v33  ;;  %v3424_v13 = vrot.slane %v3909_v4, %v4517_v33  ;;  %v3432_v48 = vrot.slane %v3425_v41, %v4517_v33  ;;  %v3440_v31 = vrot.slane %v3910_v16, %v4517_v33 }
 0x53f   :  { %v3477_v11 = vcombine.low %v3245_v1, %v3252_v57  ;;  %v3911_v35 = vcombine.high %v3245_v1, %v3252_v57  ;;  %v3493_v60 = vcombine.low %v3261_v29, %v3268_v30  ;;  %v3912_v53 = vcombine.high %v3261_v29, %v3268_v30 }
 0x540   :  { %v3042_v51 = vpop.f32.mrb[28].mxu0  ;;  %v3441_v45 = vcombine.low %v3416_v18, %v3424_v13  ;;  %v3457_v8 = vcombine.low %v3432_v48, %v3440_v31  ;;  %v3442_v17 = vcombine.high %v3416_v18, %v3424_v13  ;;  %v3458_v38 = vcombine.high %v3432_v48, %v3440_v31 }
 0x541   :  { %v4052_v3 = vpop.f32.mrb[29].mxu0  ;;  %v3484_v5 = vrot.slane %v3477_v11, %v4517_v33  ;;  %v3492_v34 = vrot.slane %v3911_v35, %v4517_v33  ;;  %v3500_v4 = vrot.slane %v3493_v60, %v4517_v33  ;;  %v3508_v41 = vrot.slane %v3912_v53, %v4517_v33 }
 0x542   :  { %v3045_v39 = vpop.f32.mrb[30].mxu0  ;;  %v5447_v16 = vrot.slane %v3441_v45, %v4528_v43  ;;  %v5450_v1 = vrot.slane %v3457_v8, %v4528_v43  ;;  %v3456_v57 = vrot.slane %v3442_v17, %v4528_v43  ;;  %v3472_v29 = vrot.slane %v3458_v38, %v4528_v43 }
 0x543   :  { %v4053_v30 = vpop.f32.mrb[31].mxu0  ;;  %v3509_v18 = vcombine.low %v3484_v5, %v3492_v34  ;;  %v3525_v13 = vcombine.low %v3500_v4, %v3508_v41  ;;  %v3510_v48 = vcombine.high %v3484_v5, %v3492_v34  ;;  %v3526_v31 = vcombine.high %v3500_v4, %v3508_v41 }
 0x544   :  { %v3474_v35 = vcombine.high %v5447_v16, %v5450_v1  ;;  %v3475_v60 = vcombine.low %v3456_v57, %v3472_v29  ;;  %v3476_v53 = vcombine.high %v3456_v57, %v3472_v29 }
 0x545   :  { %v5459_v45 = vrot.slane %v3509_v18, %v4528_v43  ;;  %v5462_v8 = vrot.slane %v3525_v13, %v4528_v43  ;;  %v3524_v17 = vrot.slane %v3510_v48, %v4528_v43  ;;  %v3540_v38 = vrot.slane %v3526_v31, %v4528_v43 }
 0x547   :  { %v3542_v3 = vcombine.high %v5459_v45, %v5462_v8  ;;  %v3543_v34 = vcombine.low %v3524_v17, %v3540_v38  ;;  %v3544_v4 = vcombine.high %v3524_v17, %v3540_v38 }
 0x549   :  { %v4097_v41 = vpack.i.bf16 %v3542_v3, %v3474_v35  ;;  %v4102_v57 = vpack.i.bf16 %v3543_v34, %v3475_v60  ;;  %v5470_v29 = vpack.i.bf16 %v3544_v4, %v3476_v53 }
 0x54b   :  { %4098 = vrot.lane.b32.xlu1 %v4097_v41, %s4388_s25 }
 0x54f   :  { %4103 = vrot.lane.b32.xlu1 %v4102_v57, %s4399_s5 }
 0x562   :  { %v2998_v30 = vpop.f32.mrb[24].mxu1 }
 0x563   :  { %v4046_v18 = vpop.f32.mrb[25].mxu1 }
 0x564   :  { %v3001_v13 = vpop.f32.mrb[26].mxu1 }
 0x565   :  { %v4047_v48 = vpop.f32.mrb[27].mxu1 }
 0x56a   :  { %v3086_v31 = vpop.f32.mrb[28].mxu1  ;;  %v3130_v11 = vpop.f32.mrb[32].mxu0 }
 0x56b   :  { %v3273_v56 = vcombine.low %v2998_v30, %v3086_v31  ;;  %v3274_v20 = vcombine.high %v2998_v30, %v3086_v31  ;;  %v3289_v5 = vcombine.low %v3042_v51, %v3130_v11  ;;  %v3290_v44 = vcombine.high %v3042_v51, %v3130_v11  ;;  %v4058_v17 = vpop.f32.mrb[29].mxu1  ;;  %v4064_v35 = vpop.f32.mrb[33].mxu0 }
 0x56c   :  { %v3089_v60 = vpop.f32.mrb[30].mxu1  ;;  %v3133_v53 = vpop.f32.mrb[34].mxu0 }
 0x56d   :  { %v3281_v38 = vrot.slane %v3273_v56, %v4517_v33  ;;  %v3288_v3 = vrot.slane %v3274_v20, %v4517_v33  ;;  %v3297_v34 = vrot.slane %v3289_v5, %v4517_v33  ;;  %v3304_v4 = vrot.slane %v3290_v44, %v4517_v33  ;;  %v4059_v41 = vpop.f32.mrb[31].mxu1  ;;  %v4065_v57 = vpop.f32.mrb[35].mxu0 }
 0x56e   :  { %v3341_v18 = vcombine.low %v3001_v13, %v3089_v60  ;;  %v3342_v48 = vcombine.high %v3001_v13, %v3089_v60  ;;  %v3357_v26 = vcombine.low %v3045_v39, %v3133_v53  ;;  %v3358_v30 = vcombine.high %v3045_v39, %v3133_v53 }
 0x56f   :  { %v3305_v31 = vcombine.low %v3281_v38, %v3297_v34  ;;  %v3306_v51 = vcombine.high %v3281_v38, %v3297_v34  ;;  %v3321_v11 = vcombine.low %v3288_v3, %v3304_v4  ;;  %v3322_v17 = vcombine.high %v3288_v3, %v3304_v4 }
 0x570   :  { %v3349_v35 = vrot.slane %v3341_v18, %v4517_v33  ;;  %v3356_v56 = vrot.slane %v3342_v48, %v4517_v33  ;;  %v3365_v20 = vrot.slane %v3357_v26, %v4517_v33  ;;  %v3372_v5 = vrot.slane %v3358_v30, %v4517_v33 }
 0x571   :  { %v3313_v44 = vrot.slane %v3305_v31, %v4528_v43  ;;  %v3320_v41 = vrot.slane %v3306_v51, %v4528_v43  ;;  %v3329_v13 = vrot.slane %v3321_v11, %v4528_v43  ;;  %v3336_v39 = vrot.slane %v3322_v17, %v4528_v43 }
 0x572   :  { %v3373_v60 = vcombine.low %v3349_v35, %v3365_v20  ;;  %v3374_v53 = vcombine.high %v3349_v35, %v3365_v20  ;;  %v3389_v38 = vcombine.low %v3356_v56, %v3372_v5  ;;  %v3390_v3 = vcombine.high %v3356_v56, %v3372_v5 }
 0x573   :  { %v3545_v34 = vcombine.low %v3313_v44, %v3320_v41  ;;  %v3913_v4 = vcombine.high %v3313_v44, %v3320_v41  ;;  %v3561_v57 = vcombine.low %v3329_v13, %v3336_v39  ;;  %v3914_v18 = vcombine.high %v3329_v13, %v3336_v39 }
 0x574   :  { %v3381_v26 = vrot.slane %v3373_v60, %v4528_v43  ;;  %v3388_v48 = vrot.slane %v3374_v53, %v4528_v43  ;;  %v3397_v30 = vrot.slane %v3389_v38, %v4528_v43  ;;  %v3404_v31 = vrot.slane %v3390_v3, %v4528_v43  ;;  %v4199_v53 = vld [vmem:[#allocation7] sm:$0xff]  }
 0x575   :  { %v3552_v51 = vrot.slane %v3545_v34, %v4517_v33  ;;  %v3560_v11 = vrot.slane %v3913_v4, %v4517_v33  ;;  %v3568_v17 = vrot.slane %v3561_v57, %v4517_v33  ;;  %v3576_v35 = vrot.slane %v3914_v18, %v4517_v33  ;;  %4066 = vmatprep.subr.bf16.mxu1 %v4199_v53 }
 0x576   :  { %v3613_v56 = vcombine.low %v3381_v26, %v3388_v48  ;;  %v3915_v20 = vcombine.high %v3381_v26, %v3388_v48  ;;  %v3629_v5 = vcombine.low %v3397_v30, %v3404_v31  ;;  %v3916_v44 = vcombine.high %v3397_v30, %v3404_v31  ;;  %4067 = vmatpush3.bf16.msra.mxu1 %v4199_v53 }
 0x577   :  { %v3578_v41 = vcombine.high %v3552_v51, %v3560_v11  ;;  %v3594_v13 = vcombine.high %v3568_v17, %v3576_v35  ;;  %v3577_v39 = vcombine.low %v3552_v51, %v3560_v11  ;;  %v3593_v60 = vcombine.low %v3568_v17, %v3576_v35 }
 0x578   :  { %v3620_v38 = vrot.slane %v3613_v56, %v4517_v33  ;;  %v3628_v3 = vrot.slane %v3915_v20, %v4517_v33  ;;  %v3636_v34 = vrot.slane %v3629_v5, %v4517_v33  ;;  %v3644_v4 = vrot.slane %v3916_v44, %v4517_v33 }
 0x579   :  { %v3592_v57 = vrot.slane %v3578_v41, %v4528_v43  ;;  %v3608_v18 = vrot.slane %v3594_v13, %v4528_v43  ;;  %v5501_v26 = vrot.slane %v3577_v39, %v4528_v43  ;;  %v5504_v48 = vrot.slane %v3593_v60, %v4528_v43  ;;  %v4200_v13 = vld [vmem:[#allocation7 + $0x8] sm:$0xff]  }
 0x57a   :  { %v3646_v30 = vcombine.high %v3620_v38, %v3628_v3  ;;  %v3662_v31 = vcombine.high %v3636_v34, %v3644_v4  ;;  %v3645_v51 = vcombine.low %v3620_v38, %v3628_v3  ;;  %v3661_v11 = vcombine.low %v3636_v34, %v3644_v4  ;;  %4068 = vmatprep.subr.bf16.mxu1 %v4200_v13 }
 0x57b   :  { %v3611_v17 = vcombine.low %v3592_v57, %v3608_v18  ;;  %v3609_v33 = vcombine.low %v5501_v26, %v5504_v48  ;;  %v3610_v35 = vcombine.high %v5501_v26, %v5504_v48  ;;  %v3612_v56 = vcombine.high %v3592_v57, %v3608_v18  ;;  %4069 = vmatpush3.bf16.msra.mxu1 %v4200_v13 }
 0x57c   :  { %v3660_v20 = vrot.slane %v3646_v30, %v4528_v43  ;;  %v3676_v5 = vrot.slane %v3662_v31, %v4528_v43  ;;  %v3653_v44 = vrot.slane %v3645_v51, %v4528_v43  ;;  %v3669_v41 = vrot.slane %v3661_v11, %v4528_v43 }
 0x57d   :  { %v5518_v3 = vrot.slane %v2568_v63, %v4528_v43  ;;  %v5524_v18 = vrot.slane %v2500_v61, %v4528_v43  ;;  %v5695_v63 = vcombine.low %v5211_v19, %v5217_v40  ;;  %v5696_v48 = vmov 0.0  }
 0x57e   :  { %v3679_v39 = vcombine.low %v3660_v20, %v3676_v5  ;;  %v3678_v60 = vcombine.high %v3653_v44, %v3669_v41  ;;  %v3677_v53 = vcombine.low %v3653_v44, %v3669_v41  ;;  %v3680_v38 = vcombine.high %v3660_v20, %v3676_v5 }
 0x57f   :  { %v5538_v26 = vrot.slane %v5695_v63, %v4528_v43  ;;  %v2600_v55 = vcombine.high %v5518_v3, %v5696_v48  ;;  %v2532_v9 = vcombine.high %v5524_v18, %v5696_v48  ;;  %v2464_v37 = vcombine.high %v5532_v0, %v5696_v48 }
 0x580   :  { %v4117_v34 = vpack.i.bf16 %v3679_v39, %v3611_v17  ;;  %v4107_v4 = vpack.i.bf16 %v3678_v60, %v3610_v35  ;;  %v4122_v57 = vpack.i.bf16 %v3680_v38, %v3612_v56  ;;  %v5697_v43 = vpack.i.bf16 %v5304_v46, %v5272_v23 }
 0x581   :  { %v2396_v36 = vcombine.high %v5538_v26, %v5696_v48  ;;  %v4132_v61 = vpack.i.bf16 %v2600_v55, %v2464_v37  ;;  %v5698_v40 = vpack.i.bf16 %v5378_v58, %v5300_v28  ;;  %v5700_v30 = vpack.i.bf16 %v5394_v2, %v5382_v54 }
 0x582   :  { %4118 = vrot.lane.b32.xlu1 %v4117_v34, %s4399_s5  ;;  %4108 = vrot.lane.b32.xlu0 %v4107_v4, %s4388_s25  ;;  %v5701_v31 = vpack.i.bf16 %v5315_v52, %v5275_v25  ;;  %v5702_v23 = vpack.i.bf16 %v5385_v24, %v5367_v42  ;;  %v5703_v28 = vpack.i.bf16 %v5339_v12, %v5312_v15 }
 0x583   :  { %v4127_v19 = vpack.i.bf16 %v2532_v9, %v2396_v36  ;;  %v5704_v46 = vpack.i.bf16 %v5408_v32, %v5398_v50  ;;  %v5706_v25 = vpack.i.bf16 %v5388_v49, %v5373_v14  ;;  %v5707_v52 = vpack.i.bf16 %v5357_v59, %v5322_v27 }
 0x584   :  { %v5708_v15 = vpack.i.bf16 %v5414_v6, %v5402_v10  ;;  %v5709_v10 = vcombine.low %v5447_v16, %v5450_v1  ;;  %v5710_v6 = vcombine.low %v5459_v45, %v5462_v8 }
 0x586   :  { %4123 = vrot.lane.b32.xlu1 %v4122_v57, %s4400_s27  ;;  %4113 = vrot.lane.b32.xlu0 %v5470_v29, %s4400_s27  ;;  %v5699_v29 = vpack.i.bf16 %v5333_v62, %v5308_v7  ;;  %v5705_v7 = vpack.i.bf16 %v5318_v21, %v5290_v22 }
 0x58a   :  { %4133 = vrot.lane.b32.xlu1 %v4132_v61, %s4399_s5  ;;  %4128 = vrot.lane.b32.xlu0 %v4127_v19, %s4399_s5 }
 0x58e   :  { %4143 = vrot.lane.b32.xlu1 %v5697_v43, %s4401_s28  ;;  %4138 = vrot.lane.b32.xlu0 %v5698_v40, %s4401_s28 }
 0x592   :  { %4153 = vrot.lane.b32.xlu1 %v5699_v29, %s4402_s29  ;;  %4148 = vrot.lane.b32.xlu0 %v5700_v30, %s4402_s29 }
 0x596   :  { %4163 = vrot.lane.b32.xlu1 %v5701_v31, %s4384_s11  ;;  %4158 = vrot.lane.b32.xlu0 %v5702_v23, %s4384_s11 }
 0x59a   :  { %4173 = vrot.lane.b32.xlu1 %v5703_v28, %s4403_s30  ;;  %4168 = vrot.lane.b32.xlu0 %v5704_v46, %s4403_s30 }
 0x59e   :  { %4183 = vrot.lane.b32.xlu1 %v5705_v7, %s4393_s21  ;;  %4178 = vrot.lane.b32.xlu0 %v5706_v25, %s4393_s21 }
 0x5a2   :  { %4193 = vrot.lane.b32.xlu1 %v5707_v52, %s4392_s2  ;;  %4188 = vrot.lane.b32.xlu0 %v5708_v15, %s4392_s2 }
 0x5bd   :  { %v4099_v62 = vpop.permute.xlu1 %4098 }
 0x5be   :  { %v4101_v42 = vunpack.i.h.bf16 %v4099_v62  ;;  %v4100_v22 = vunpack.i.l.bf16 %v4099_v62 }
 0x5c0   :  { %v3729_v32 = vsel %vm1778_vm2, %v5709_v10, %v4100_v22  ;;  %v3730_v51 = vsel %vm1778_vm2, %v5710_v6, %v4101_v42 }
 0x5c1   :  { %v4104_v12 = vpop.permute.xlu1 %4103 }
 0x5c2   :  { %v4106_v14 = vunpack.i.h.bf16 %v4104_v12  ;;  %v4105_v49 = vunpack.i.l.bf16 %v4104_v12 }
 0x5c4   :  { %v3734_v44 = vsel %vm2155_vm3, %v3730_v51, %v4106_v14 }
 0x5f4   :  { %v4119_v21 = vpop.permute.xlu1 %4118  ;;  %v4109_v58 = vpop.permute.xlu0 %4108 }
 0x5f5   :  { %v4111_v54 = vunpack.i.h.bf16 %v4109_v58  ;;  %v4110_v24 = vunpack.i.l.bf16 %v4109_v58  ;;  %v4121_v2 = vunpack.i.h.bf16 %v4119_v21  ;;  %v4120_v50 = vunpack.i.l.bf16 %v4119_v21 }
 0x5f7   :  { %v3731_v27 = vsel %vm1778_vm2, %v3609_v33, %v4110_v24  ;;  %v3732_v59 = vsel %vm1778_vm2, %v3677_v53, %v4111_v54  ;;  %v3733_v33 = vsel %vm2155_vm3, %v3729_v32, %v4105_v49 }
 0x5f8   :  { %v4124_v11 = vpop.permute.xlu1 %4123  ;;  %v4114_v17 = vpop.permute.xlu0 %4113  ;;  %v3735_v16 = vsel %vm2155_vm3, %v3731_v27, %v4120_v50  ;;  %v3736_v1 = vsel %vm2155_vm3, %v3732_v59, %v4121_v2 }
 0x5f9   :  { %v4126_v35 = vunpack.i.h.bf16 %v4124_v11  ;;  %v4125_v56 = vunpack.i.l.bf16 %v4124_v11  ;;  %v4116_v20 = vunpack.i.h.bf16 %v4114_v17  ;;  %v4115_v5 = vunpack.i.l.bf16 %v4114_v17 }
 0x5fb   :  { %v3740_v41 = vsel %vm3737_vm4, %v3735_v16, %v4125_v56  ;;  %v3741_v13 = vsel %vm3737_vm4, %v3736_v1, %v4126_v35  ;;  %v3739_v45 = vsel %vm3737_vm4, %v3734_v44, %v4116_v20  ;;  %v3738_v8 = vsel %vm3737_vm4, %v3733_v33, %v4115_v5 }
 0x5fc   :  { %v3743_v39 = vpack.c.bf16 %v3741_v13, %v3740_v41  ;;  %v3742_v60 = vpack.c.bf16 %v3739_v45, %v3738_v8  ;;  %v4134_v53 = vpop.permute.xlu1 %4133  ;;  %v4129_v38 = vpop.permute.xlu0 %4128 }
 0x5fd   :  { %v4136_v63 = vunpack.i.h.bf16 %v4134_v53  ;;  %v4135_v48 = vunpack.i.l.bf16 %v4134_v53  ;;  %v4131_v55 = vunpack.i.h.bf16 %v4129_v38  ;;  %v4130_v9 = vunpack.i.l.bf16 %v4129_v38 }
 0x5fe   :  { %4070 = vmatprep.mubr.msk.bf16.mxu1 %vm98_vm0, %v3742_v60 }
 0x5ff   :  { %4071 = vmatmul.mubr.msk.bf16.vlgmr.msra.gmra.mrb[32].mxu1 %vm98_vm0, %v3743_v39  ;;  %v2736_v29 = vsel %vm2155_vm3, %v5518_v3, %v4136_v63  ;;  %v2735_v30 = vsel %vm2155_vm3, %v5532_v0, %v4135_v48  ;;  %v2717_v31 = vsel %vm2155_vm3, %v5524_v18, %v4131_v55  ;;  %v2716_v23 = vsel %vm2155_vm3, %v5538_v26, %v4130_v9 }
 0x600   :  { %v4144_v34 = vpop.permute.xlu1 %4143  ;;  %v4139_v4 = vpop.permute.xlu0 %4138 }
 0x601   :  { %v4146_v61 = vunpack.i.h.bf16 %v4144_v34  ;;  %v4145_v19 = vunpack.i.l.bf16 %v4144_v34  ;;  %v4141_v43 = vunpack.i.h.bf16 %v4139_v4  ;;  %v4140_v40 = vunpack.i.l.bf16 %v4139_v4 }
 0x603   :  { %v2737_v62 = vsel %vm98_vm0, %v2735_v30, %v4145_v19  ;;  %v2738_v3 = vsel %vm98_vm0, %v2736_v29, %v4146_v61  ;;  %v2718_v12 = vsel %vm98_vm0, %v2716_v23, %v4140_v40  ;;  %v2719_v0 = vsel %vm98_vm0, %v2717_v31, %v4141_v43 }
 0x604   :  { %v4154_v57 = vpop.permute.xlu1 %4153  ;;  %v4149_v47 = vpop.permute.xlu0 %4148 }
 0x605   :  { %v4156_v7 = vunpack.i.h.bf16 %v4154_v57  ;;  %v4155_v25 = vunpack.i.l.bf16 %v4154_v57  ;;  %v4151_v52 = vunpack.i.h.bf16 %v4149_v47  ;;  %v4150_v15 = vunpack.i.l.bf16 %v4149_v47 }
 0x607   :  { %v2739_v2 = vsel %vm2720_vm5, %v2737_v62, %v4155_v25  ;;  %v2740_v50 = vsel %vm2720_vm5, %v2738_v3, %v4156_v7  ;;  %v2721_v27 = vsel %vm2720_vm5, %v2718_v12, %v4150_v15  ;;  %v2722_v59 = vsel %vm2720_vm5, %v2719_v0, %v4151_v52 }
 0x608   :  { %v4164_v37 = vpop.permute.xlu1 %4163  ;;  %v4159_v36 = vpop.permute.xlu0 %4158 }
 0x609   :  { %v4166_v42 = vunpack.i.h.bf16 %v4164_v37  ;;  %v4165_v18 = vunpack.i.l.bf16 %v4164_v37  ;;  %v4161_v22 = vunpack.i.h.bf16 %v4159_v36  ;;  %v4160_v21 = vunpack.i.l.bf16 %v4159_v36 }
 0x60b   :  { %v2741_v11 = vsel %vm2723_vm6, %v2739_v2, %v4165_v18  ;;  %v2742_v17 = vsel %vm2723_vm6, %v2740_v50, %v4166_v42  ;;  %v2724_v35 = vsel %vm2723_vm6, %v2721_v27, %v4160_v21  ;;  %v2725_v56 = vsel %vm2723_vm6, %v2722_v59, %v4161_v22 }
 0x60c   :  { %v4174_v28 = vpop.permute.xlu1 %4173  ;;  %v4169_v46 = vpop.permute.xlu0 %4168 }
 0x60d   :  { %v4176_v26 = vunpack.i.h.bf16 %v4174_v28  ;;  %v4175_v58 = vunpack.i.l.bf16 %v4174_v28  ;;  %v4171_v54 = vunpack.i.h.bf16 %v4169_v46  ;;  %v4170_v24 = vunpack.i.l.bf16 %v4169_v46 }
 0x60f   :  { %v2743_v20 = vsel %vm2726_vm7, %v2741_v11, %v4175_v58  ;;  %v2744_v5 = vsel %vm2726_vm7, %v2742_v17, %v4176_v26  ;;  %v2727_v33 = vsel %vm2726_vm7, %v2724_v35, %v4170_v24  ;;  %v2728_v44 = vsel %vm2726_vm7, %v2725_v56, %v4171_v54 }
 0x610   :  { %v4184_v14 = vpop.permute.xlu1 %4183  ;;  %v4179_v49 = vpop.permute.xlu0 %4178 }
 0x611   :  { %v4186_v10 = vunpack.i.h.bf16 %v4184_v14  ;;  %v4185_v32 = vunpack.i.l.bf16 %v4184_v14  ;;  %v4181_v6 = vunpack.i.h.bf16 %v4179_v49  ;;  %v4180_v51 = vunpack.i.l.bf16 %v4179_v49 }
 0x613   :  { %v2745_v39 = vsel %vm2729_vm8, %v2743_v20, %v4185_v32  ;;  %v2746_v60 = vsel %vm2729_vm8, %v2744_v5, %v4186_v10  ;;  %v2730_v53 = vsel %vm2729_vm8, %v2727_v33, %v4180_v51  ;;  %v2731_v38 = vsel %vm2729_vm8, %v2728_v44, %v4181_v6 }
 0x614   :  { %v4194_v16 = vpop.permute.xlu1 %4193  ;;  %v4189_v1 = vpop.permute.xlu0 %4188 }
 0x615   :  { %v4196_v41 = vunpack.i.h.bf16 %v4194_v16  ;;  %v4195_v13 = vunpack.i.l.bf16 %v4194_v16  ;;  %v4191_v45 = vunpack.i.h.bf16 %v4189_v1  ;;  %v4190_v8 = vunpack.i.l.bf16 %v4189_v1 }
 0x617   :  { %v2747_v34 = vsel %vm2732_vm9, %v2745_v39, %v4195_v13  ;;  %v2748_v4 = vsel %vm2732_vm9, %v2746_v60, %v4196_v41  ;;  %v2733_v57 = vsel %vm2732_vm9, %v2730_v53, %v4190_v8  ;;  %v2734_v47 = vsel %vm2732_vm9, %v2731_v38, %v4191_v45 }
 0x618   :  { %v3897_v63 = vpack.c.bf16 %v2747_v34, %v2733_v57  ;;  %v3898_v48 = vpack.c.bf16 %v2748_v4, %v2734_v47 }
 0x61a   :  { %3899 = vst.sshfl [vmem:[#allocation9] sm:$0x33 pattern:$0x76325410] %v3897_v63 }
 0x61b   :  { %3900 = vst.sshfl [vmem:[#allocation9 + $0x4] sm:$0x33 pattern:$0x76325410] %v3898_v48 }
 0x61c   :  { %4342 = shalt.err (!%p4339_p0)
}
 0x61d   :  { %s4343_s15 = scalar_lea.hbm %s5685_s7, 128 }
 0x61e   :  { %p4344_p1 = scmp.ne.s32.totalorder %s5685_s7, %s4343_s15  ;;  %p4347_p2 = scmp.lt.u32.totalorder %s4343_s15, %s5685_s7 }
 0x620   :  { %p4349_p3 = pnand %p4347_p2, %p4344_p1 }
 0x622   :  { %4352 = shalt.err (!%p4349_p3)
}
 0x623   :  { %3849 = dma.vmem_to_hbm [thread:$0]  %s3844_s9, 128, %s5685_s7, [#allocation10], %s4384_s11, %s4384_s11, %s4385_s12  }
 0x624   :  { %v3917_v55 = vld [vmem:[%s5682_s4] ss:$0 sm:$0xff]  ;;  %s4405_s21 = smov [#allocation8]  }
 0x625   :  { %s3831_s22 = sshll.u32 %s4405_s21, 4  ;;  %s3832_s22 = int_to_ptr.vmem [resolvable:$true] %s3831_s22 }
 0x626   :  { %s4353_s4 = scalar_lea.vmem %s3832_s22, 512  ;;  %p4358_p5 = scmp.lt.s32.totalorder %s3832_s22, %s3832_s22 }
 0x627   :  { %p4354_p4 = scmp.ne.s32.totalorder %s3832_s22, %s4353_s4  ;;  %p4359_p6 = scmp.lt.s32.totalorder %s4353_s4, %s4353_s4 }
 0x629   :  { %p4360_p7 = por %p4359_p6, %p4358_p5 }
 0x62b   :  { %p4361_p8 = pnand %p4360_p7, %p4354_p4 }
 0x6d2   :  { %v4072_v9 = vpop.f32.mrb[32].mxu1 }
 0x6d3   :  { %v3816_v37 = vadd.f32 %v4072_v9, %v3917_v55  ;;  %v3807_v36 = vpop.f32.mrb[33].mxu1 }
 0x6d4   :  { %v3808_v61 = vadd.f32 %v3917_v55, %v3807_v36  ;;  %v4073_v19 = vpop.f32.mrb[34].mxu1 }
 0x6d5   :  { %3824 = vst.msk [vmem:[#allocation8 + $0x10] sm:$0xff] %vm98_vm0, %v3816_v37  ;;  %v3819_v43 = vadd.f32 %v4073_v19, %v3917_v55  ;;  %v3810_v40 = vpop.f32.mrb[35].mxu1 }
 0x6d6   :  { %3822 = vst.msk [vmem:[#allocation8] sm:$0xff] %vm98_vm0, %v3808_v61  ;;  %v3811_v29 = vadd.f32 %v3917_v55, %v3810_v40 }
 0x6d7   :  { %3825 = vst.msk [vmem:[#allocation8 + $0x18] sm:$0xff] %vm98_vm0, %v3819_v43 }
 0x6d8   :  { %3823 = vst.msk [vmem:[#allocation8 + $0x8] sm:$0xff] %vm98_vm0, %v3811_v29 }
 0x6d9   :  { %4364 = shalt.err (!%p4361_p8)
}
 0x6da   :  { %s4365_s12 = scalar_lea.hbm %s5684_s6, 512 }
 0x6db   :  { %p4366_p9 = scmp.ne.s32.totalorder %s5684_s6, %s4365_s12  ;;  %p4369_p10 = scmp.lt.u32.totalorder %s4365_s12, %s5684_s6 }
 0x6dd   :  { %p4371_p11 = pnand %p4369_p10, %p4366_p9 }
 0x6df   :  { %4374 = shalt.err (!%p4371_p11)
}
 0x6e0   :  { %3837 = dma.vmem_to_hbm [thread:$0]  %s3832_s22, 512, %s5684_s6, [#allocation4], %s4387_s1, %s4387_s1, %s4388_s25  }
 0x6e1   :  { %4379 = dma.done.wait [#allocation4], 512  }
 0x6e2   :  { %4380 = vsyncadd [#allocation4], 4294966784 }
 0x6e3   :  { %4381 = dma.done.wait [#allocation10], 128  }
 0x6e4   :  { %4382 = vsyncadd [#allocation10], 4294967168 }
 0x6e5   :  { %3856 = vsyncpa [#allocation3], 1 }
 0x6e6   :  { %3857 = vsyncpa [#allocation6], 1 }
 0x6e7   :  { %3858 = vsyncpa [#allocation4], 1 }
 0x6e8   :  { %3859 = vsyncpa [#allocation10], 1 }

</bundles_post_ra>
